<compile_context>
chip_gen: v7x
topology: tpu7x:2x2x1
jax: 0.10.0
libtpu: 0.0.40
codegen_flags: <defaults>
</compile_context>

<pallas_src>
import functools

import jax
import jax.numpy as jnp
import numpy as np
from jax.experimental import pallas as pl
from jax.experimental.pallas import tpu as pltpu


def _round_up(x, m):
    return (x + m - 1) // m * m


def _matmul_bias_act_kernel(w_ref, x_ref, b_ref, o_ref, *, act):
    # w_ref: (R, K) bf16   x_ref: (K, tm) bf16   b_ref: (R, 1) f32   o_ref: (R, tm) f32
    z = jnp.dot(w_ref[...], x_ref[...], preferred_element_type=jnp.float32)
    z = z + b_ref[...]                       # bias broadcast over the lane dim
    if act == "relu":
        z = jnp.maximum(z, 0.0)
    elif act == "sigmoid":
        z = 1.0 / (1.0 + jnp.exp(-z))
    o_ref[...] = z.astype(o_ref.dtype)


def _pallas_matmul_bias_act(wm, pt, b, act, *, max_tm=512):
    """Channel-major fused matmul: (R, K) @ (K, M) + b[:, None], activation.

    Output (R, M) f32 with the M axis (padded to a multiple of 128) as the lane
    dim, so stores are lane-dense.  Weights and bias stay VMEM-resident.
    """
    R, K = wm.shape
    K2, M = pt.shape
    assert K == K2
    tm = min(max_tm, _round_up(M, 128))
    m_pad = _round_up(M, tm)
    if m_pad != M:
        # Cheap: the phase-decomposed patch matrix is small (no zero-insert blow-up).
        pt = jnp.pad(pt, ((0, 0), (0, m_pad - M)))
    out = pl.pallas_call(
        functools.partial(_matmul_bias_act_kernel, act=act),
        out_shape=jax.ShapeDtypeStruct((R, m_pad), jnp.float32),
        grid=(m_pad // tm,),
        in_specs=[
            pl.BlockSpec((R, K), lambda i: (0, 0)),    # weights: resident
            pl.BlockSpec((K, tm), lambda i: (0, i)),   # patch tile (lane-dense)
            pl.BlockSpec((R, 1), lambda i: (0, 0)),    # bias: resident
        ],
        out_specs=pl.BlockSpec((R, tm), lambda i: (0, i)),
        compiler_params=pltpu.CompilerParams(
            dimension_semantics=("parallel",)),
    )(wm, pt, b.reshape(R, 1))
    return out[:, :M]


def conv_transpose2d_cm(x_cm, w, b, stride, act):
    """PyTorch-semantics ConvTranspose2d (padding=0) on channel-major activations.

    x_cm: (Cin, N, H, W)   w: (Cin, Cout, k, k)   b: (Cout,)
    returns (Cout, N, (H-1)*stride + k, (W-1)*stride + k)
    """
    cin, n, h, wd = x_cm.shape
    cin2, cout, k, _ = w.shape
    assert cin == cin2
    s = stride
    assert k % s == 0, "sub-pixel decomposition needs k % stride == 0"
    r = k // s
    hp, wp = h + r - 1, wd + r - 1

    # Patches P^T: (Cin*r*r, N*Hp*Wp), built from the (r-1)-padded input.
    xpad = jnp.pad(x_cm, ((0, 0), (0, 0), (r - 1, r - 1), (r - 1, r - 1)))
    cols = [xpad[:, :, ti:ti + hp, tj:tj + wp]
            for ti in range(r) for tj in range(r)]
    pt = jnp.stack(cols, axis=1).reshape(cin * r * r, n * hp * wp)

    # Phase-merged weights: Wm[(p,q,co),(ci,ti,tj)] = w[ci,co,(r-1-ti)*s+p,(r-1-tj)*s+q]
    wr = w.reshape(cin, cout, r, s, r, s)[:, :, ::-1, :, ::-1, :]
    wm = wr.transpose(3, 5, 1, 0, 2, 4).reshape(s * s * cout, cin * r * r)
    bm = jnp.tile(b, s * s)                                 # bias per (p, q, co) row

    z = _pallas_matmul_bias_act(
        wm.astype(jnp.bfloat16), pt.astype(jnp.bfloat16), bm, act)

    # Pixel shuffle: Z[(p,q,co),(n,u,v)] -> y[co, n, u*s+p, v*s+q]
    z = z.reshape(s, s, cout, n, hp, wp).transpose(2, 3, 4, 0, 5, 1)
    return z.reshape(cout, n, hp * s, wp * s)


def init_params(key, n_input_channels):
    """Deterministic synthetic parameters (PyTorch ConvTranspose2d layout (Cin,Cout,k,k))."""
    specs = [(64, 64, 3), (64, 32, 4), (32, n_input_channels, 8)]
    params = []
    for cin, cout, k in specs:
        key, k1, k2 = jax.random.split(key, 3)
        bound = 1.0 / np.sqrt(cin * k * k)
        w = jax.random.uniform(k1, (cin, cout, k, k), jnp.float32, -bound, bound)
        bb = jax.random.uniform(k2, (cout,), jnp.float32, -bound, bound)
        params.append((w, bb))
    return params


def cnn_decoder_forward(latent, params):
    """CNNDecoder.forward for features_dim=3136: latent (N, 3136) -> (N, C, 84, 84)."""
    n = latent.shape[0]
    x = latent.reshape(n, 64, 7, 7).transpose(1, 0, 2, 3)        # channel-major (64, N, 7, 7)
    (w1, b1), (w2, b2), (w3, b3) = params
    x = conv_transpose2d_cm(x, w1, b1, stride=1, act="relu")     # (64, N,  9,  9)
    x = conv_transpose2d_cm(x, w2, b2, stride=2, act="relu")     # (32, N, 20, 20)
    x = conv_transpose2d_cm(x, w3, b3, stride=4, act="sigmoid")  # ( C, N, 84, 84)
    # TODO(synk): at this batch size all three layers fit VMEM and could be fused
    # into a single pallas_call; kept per-layer for clarity/robustness.
    return x.transpose(1, 0, 2, 3)                               # NCHW


def reference_forward(latent, params):
    """Pure-XLA f32 reference matching torch.nn.ConvTranspose2d (padding=0) semantics."""
    x = latent.reshape(-1, 64, 7, 7)
    strides = [1, 2, 4]
    acts = [jax.nn.relu, jax.nn.relu, jax.nn.sigmoid]
    for (w, b), s, act in zip(params, strides, acts):
        k = w.shape[-1]
        w_conv = jnp.transpose(w, (1, 0, 2, 3))[:, :, ::-1, ::-1]   # (Cout, Cin, k, k)
        y = jax.lax.conv_general_dilated(
            x, w_conv, window_strides=(1, 1),
            padding=[(k - 1, k - 1), (k - 1, k - 1)],
            lhs_dilation=(s, s),
            dimension_numbers=("NCHW", "OIHW", "NCHW"))
        x = act(y + b[None, :, None, None])
    return x


if __name__ == "__main__":
    key = jax.random.PRNGKey(0)
    key, pkey, xkey = jax.random.split(key, 3)

    n_input_channels = 4          # observation_shape = (4, 84, 84)
    batch = 2
    features_dim = 3136           # -> latent reshaped to (batch, 64, 7, 7)

    params = init_params(pkey, n_input_channels)
    latent = jax.random.normal(xkey, (batch, features_dim), jnp.float32)

    out = jax.jit(cnn_decoder_forward)(latent, params)
    out = jax.block_until_ready(out)
    assert out.shape == (batch, n_input_channels, 84, 84), out.shape

    ref = jax.block_until_ready(reference_forward(latent, params))
    np.testing.assert_allclose(np.asarray(out), np.asarray(ref),
                               atol=2e-3, rtol=2e-3)

    print("KERNEL_OK")
</pallas_src>

<mosaic_0001>
module attributes {stable_mosaic.version = 11 : i64} {
  func.func @_matmul_bias_act_kernel(%arg0: i32, %arg1: memref<64x576xbf16, #tpu.memory_space<vmem>>, %arg2: memref<576x256xbf16, #tpu.memory_space<vmem>>, %arg3: memref<64x1xf32, #tpu.memory_space<vmem>>, %arg4: memref<64x256xf32, #tpu.memory_space<vmem>>) attributes {dimension_semantics = [#tpu.dimension_semantics<parallel>], iteration_bounds = array<i64: 1>, scalar_prefetch = 0 : i64, scratch_operands = 0 : i64, tpu.core_type = #tpu.core_type<tc>, window_params = [{pipeline_mode = #tpu.pipeline_mode<synchronous>, transform_indices = @transform_0, window_bounds = array<i64: 64, 576>}, {transform_indices = @transform_1, window_bounds = array<i64: 576, 256>}, {pipeline_mode = #tpu.pipeline_mode<synchronous>, transform_indices = @transform_2, window_bounds = array<i64: 64, 1>}, {transform_indices = @transform_3, window_bounds = array<i64: 64, 256>}]} {
    %c0 = arith.constant 0 : index
    %c0_0 = arith.constant 0 : index
    %0 = vector.load %arg1[%c0, %c0_0] : memref<64x576xbf16, #tpu.memory_space<vmem>>, vector<64x576xbf16>
    %c0_1 = arith.constant 0 : index
    %c0_2 = arith.constant 0 : index
    %1 = vector.load %arg2[%c0_1, %c0_2] : memref<576x256xbf16, #tpu.memory_space<vmem>>, vector<576x256xbf16>
    %cst = arith.constant dense<0.000000e+00> : vector<64x256xf32>
    %2 = tpu.matmul %0, %1, %cst {dimension_numbers = #tpu.dot_dimension_numbers<[1], [0], [0], [1], [0, 0, 1, 1], [], []>} : vector<64x576xbf16>, vector<576x256xbf16>, vector<64x256xf32> -> vector<64x256xf32>
    %c0_3 = arith.constant 0 : index
    %c0_4 = arith.constant 0 : index
    %3 = vector.load %arg3[%c0_3, %c0_4] : memref<64x1xf32, #tpu.memory_space<vmem>>, vector<64x1xf32>
    %4 = vector.broadcast %3 : vector<64x1xf32> to vector<64x256xf32>
    %5 = arith.addf %2, %4 : vector<64x256xf32>
    %cst_5 = arith.constant 0.000000e+00 : f32
    %6 = vector.broadcast %cst_5 : f32 to vector<64x256xf32>
    %7 = arith.maximumf %5, %6 : vector<64x256xf32>
    %c0_6 = arith.constant 0 : index
    %c0_7 = arith.constant 0 : index
    %8 = vector.load %arg4[%c0_6, %c0_7] : memref<64x256xf32, #tpu.memory_space<vmem>>, vector<64x256xf32>
    tpu.vector_store %arg4[%c0_6, %c0_7], %7 {strides = array<i32>} : memref<64x256xf32, #tpu.memory_space<vmem>>, vector<64x256xf32>,
    return
  }
  func.func @transform_0(%arg0: i32) -> (i32, i32) {
    %c0_i32 = arith.constant 0 : i32
    %c0_i32_0 = arith.constant 0 : i32
    %c0_i32_1 = arith.constant 0 : i32
    return %c0_i32, %c0_i32_0 : i32, i32
  }
  func.func @transform_1(%arg0: i32) -> (i32, i32) {
    %c0_i32 = arith.constant 0 : i32
    %c0_i32_0 = arith.constant 0 : i32
    return %c0_i32, %arg0 : i32, i32
  }
  func.func @transform_2(%arg0: i32) -> (i32, i32) {
    %c0_i32 = arith.constant 0 : i32
    %c0_i32_0 = arith.constant 0 : i32
    %c0_i32_1 = arith.constant 0 : i32
    return %c0_i32, %c0_i32_0 : i32, i32
  }
  func.func @transform_3(%arg0: i32) -> (i32, i32) {
    %c0_i32 = arith.constant 0 : i32
    %c0_i32_0 = arith.constant 0 : i32
    return %c0_i32, %arg0 : i32, i32
  }
}

module attributes {stable_mosaic.version = 11 : i64} {
  func.func @_matmul_bias_act_kernel(%arg0: i32, %arg1: memref<128x256xbf16, #tpu.memory_space<vmem>>, %arg2: memref<256x256xbf16, #tpu.memory_space<vmem>>, %arg3: memref<128x1xf32, #tpu.memory_space<vmem>>, %arg4: memref<128x256xf32, #tpu.memory_space<vmem>>) attributes {dimension_semantics = [#tpu.dimension_semantics<parallel>], iteration_bounds = array<i64: 1>, scalar_prefetch = 0 : i64, scratch_operands = 0 : i64, tpu.core_type = #tpu.core_type<tc>, window_params = [{pipeline_mode = #tpu.pipeline_mode<synchronous>, transform_indices = @transform_0, window_bounds = array<i64: 128, 256>}, {transform_indices = @transform_1, window_bounds = array<i64: 256, 256>}, {pipeline_mode = #tpu.pipeline_mode<synchronous>, transform_indices = @transform_2, window_bounds = array<i64: 128, 1>}, {transform_indices = @transform_3, window_bounds = array<i64: 128, 256>}]} {
    %c0 = arith.constant 0 : index
    %c0_0 = arith.constant 0 : index
    %0 = vector.load %arg1[%c0, %c0_0] : memref<128x256xbf16, #tpu.memory_space<vmem>>, vector<128x256xbf16>
    %c0_1 = arith.constant 0 : index
    %c0_2 = arith.constant 0 : index
    %1 = vector.load %arg2[%c0_1, %c0_2] : memref<256x256xbf16, #tpu.memory_space<vmem>>, vector<256x256xbf16>
    %cst = arith.constant dense<0.000000e+00> : vector<128x256xf32>
    %2 = tpu.matmul %0, %1, %cst {dimension_numbers = #tpu.dot_dimension_numbers<[1], [0], [0], [1], [0, 0, 1, 1], [], []>} : vector<128x256xbf16>, vector<256x256xbf16>, vector<128x256xf32> -> vector<128x256xf32>
    %c0_3 = arith.constant 0 : index
    %c0_4 = arith.constant 0 : index
    %3 = vector.load %arg3[%c0_3, %c0_4] : memref<128x1xf32, #tpu.memory_space<vmem>>, vector<128x1xf32>
    %4 = vector.broadcast %3 : vector<128x1xf32> to vector<128x256xf32>
    %5 = arith.addf %2, %4 : vector<128x256xf32>
    %cst_5 = arith.constant 0.000000e+00 : f32
    %6 = vector.broadcast %cst_5 : f32 to vector<128x256xf32>
    %7 = arith.maximumf %5, %6 : vector<128x256xf32>
    %c0_6 = arith.constant 0 : index
    %c0_7 = arith.constant 0 : index
    %8 = vector.load %arg4[%c0_6, %c0_7] : memref<128x256xf32, #tpu.memory_space<vmem>>, vector<128x256xf32>
    tpu.vector_store %arg4[%c0_6, %c0_7], %7 {strides = array<i32>} : memref<128x256xf32, #tpu.memory_space<vmem>>, vector<128x256xf32>,
    return
  }
  func.func @transform_0(%arg0: i32) -> (i32, i32) {
    %c0_i32 = arith.constant 0 : i32
    %c0_i32_0 = arith.constant 0 : i32
    %c0_i32_1 = arith.constant 0 : i32
    return %c0_i32, %c0_i32_0 : i32, i32
  }
  func.func @transform_1(%arg0: i32) -> (i32, i32) {
    %c0_i32 = arith.constant 0 : i32
    %c0_i32_0 = arith.constant 0 : i32
    return %c0_i32, %arg0 : i32, i32
  }
  func.func @transform_2(%arg0: i32) -> (i32, i32) {
    %c0_i32 = arith.constant 0 : i32
    %c0_i32_0 = arith.constant 0 : i32
    %c0_i32_1 = arith.constant 0 : i32
    return %c0_i32, %c0_i32_0 : i32, i32
  }
  func.func @transform_3(%arg0: i32) -> (i32, i32) {
    %c0_i32 = arith.constant 0 : i32
    %c0_i32_0 = arith.constant 0 : i32
    return %c0_i32, %arg0 : i32, i32
  }
}

module attributes {stable_mosaic.version = 11 : i64} {
  func.func @_matmul_bias_act_kernel(%arg0: i32, %arg1: memref<64x128xbf16, #tpu.memory_space<vmem>>, %arg2: memref<128x512xbf16, #tpu.memory_space<vmem>>, %arg3: memref<64x1xf32, #tpu.memory_space<vmem>>, %arg4: memref<64x512xf32, #tpu.memory_space<vmem>>) attributes {dimension_semantics = [#tpu.dimension_semantics<parallel>], iteration_bounds = array<i64: 2>, scalar_prefetch = 0 : i64, scratch_operands = 0 : i64, tpu.core_type = #tpu.core_type<tc>, window_params = [{pipeline_mode = #tpu.pipeline_mode<synchronous>, transform_indices = @transform_0, window_bounds = array<i64: 64, 128>}, {transform_indices = @transform_1, window_bounds = array<i64: 128, 512>}, {pipeline_mode = #tpu.pipeline_mode<synchronous>, transform_indices = @transform_2, window_bounds = array<i64: 64, 1>}, {transform_indices = @transform_3, window_bounds = array<i64: 64, 512>}]} {
    %c0 = arith.constant 0 : index
    %c0_0 = arith.constant 0 : index
    %0 = vector.load %arg1[%c0, %c0_0] : memref<64x128xbf16, #tpu.memory_space<vmem>>, vector<64x128xbf16>
    %c0_1 = arith.constant 0 : index
    %c0_2 = arith.constant 0 : index
    %1 = vector.load %arg2[%c0_1, %c0_2] : memref<128x512xbf16, #tpu.memory_space<vmem>>, vector<128x512xbf16>
    %cst = arith.constant dense<0.000000e+00> : vector<64x512xf32>
    %2 = tpu.matmul %0, %1, %cst {dimension_numbers = #tpu.dot_dimension_numbers<[1], [0], [0], [1], [0, 0, 1, 1], [], []>} : vector<64x128xbf16>, vector<128x512xbf16>, vector<64x512xf32> -> vector<64x512xf32>
    %c0_3 = arith.constant 0 : index
    %c0_4 = arith.constant 0 : index
    %3 = vector.load %arg3[%c0_3, %c0_4] : memref<64x1xf32, #tpu.memory_space<vmem>>, vector<64x1xf32>
    %4 = vector.broadcast %3 : vector<64x1xf32> to vector<64x512xf32>
    %5 = arith.addf %2, %4 : vector<64x512xf32>
    %cst_5 = arith.constant 0.000000e+00 : f32
    %6 = vector.broadcast %cst_5 : f32 to vector<64x512xf32>
    %7 = arith.subf %6, %5 : vector<64x512xf32>
    %8 = math.exp %7 : vector<64x512xf32>
    %cst_6 = arith.constant 1.000000e+00 : f32
    %9 = vector.broadcast %cst_6 : f32 to vector<64x512xf32>
    %10 = arith.addf %9, %8 : vector<64x512xf32>
    %cst_7 = arith.constant 1.000000e+00 : f32
    %11 = vector.broadcast %cst_7 : f32 to vector<64x512xf32>
    %12 = arith.divf %11, %10 : vector<64x512xf32>
    %c0_8 = arith.constant 0 : index
    %c0_9 = arith.constant 0 : index
    %13 = vector.load %arg4[%c0_8, %c0_9] : memref<64x512xf32, #tpu.memory_space<vmem>>, vector<64x512xf32>
    tpu.vector_store %arg4[%c0_8, %c0_9], %12 {strides = array<i32>} : memref<64x512xf32, #tpu.memory_space<vmem>>, vector<64x512xf32>,
    return
  }
  func.func @transform_0(%arg0: i32) -> (i32, i32) {
    %c0_i32 = arith.constant 0 : i32
    %c0_i32_0 = arith.constant 0 : i32
    %c0_i32_1 = arith.constant 0 : i32
    return %c0_i32, %c0_i32_0 : i32, i32
  }
  func.func @transform_1(%arg0: i32) -> (i32, i32) {
    %c0_i32 = arith.constant 0 : i32
    %c0_i32_0 = arith.constant 0 : i32
    return %c0_i32, %arg0 : i32, i32
  }
  func.func @transform_2(%arg0: i32) -> (i32, i32) {
    %c0_i32 = arith.constant 0 : i32
    %c0_i32_0 = arith.constant 0 : i32
    %c0_i32_1 = arith.constant 0 : i32
    return %c0_i32, %c0_i32_0 : i32, i32
  }
  func.func @transform_3(%arg0: i32) -> (i32, i32) {
    %c0_i32 = arith.constant 0 : i32
    %c0_i32_0 = arith.constant 0 : i32
    return %c0_i32, %arg0 : i32, i32
  }
}

</mosaic_0001>

<bundles_post_ra>
// kernel: cnn_decoder_forward.3
= control target key start
LH: loop header
LB: loop body
LE: loop exit
PB: predicated region body
PF: predicated region fallthrough
CT: control target
= control target key end

     0   :  { %v1178_v1 = vmov 0   ;;  %vm619_vm0 = vcmask 523264   ;;  %s1568_s1 = inlined_call_operand.vmem [shape: bf16[576,256], index: 1, kind: input, shape index: {}]   ;;  %s1569_s0 = inlined_call_operand.vmem [shape: bf16[64,576], index: 0, kind: input, shape index: {}]   ;;  %s1570_s2 = inlined_call_operand.vmem [shape: f32[64,1], index: 2, kind: input, shape index: {}]   ;;  %s1571_s3 = inlined_call_operand.vmem [shape: f32[64,256], index: 3, kind: output, shape index: {}]  }
   0x1   :  { %v1042_v0 = vld [vmem:[%s1568_s1 + $0x4] ss:$8 sps:$4 sm:$0xff]   ;;  %1040 = vset.pattern.permute.xlu0 %v1178_v1  ;;  %1041 = vset.pattern.permute.xlu1 %v1178_v1  ;;  %v1046_v3 = vld [vmem:[%s1568_s1] ss:$8 sps:$4 sm:$0xff]   ;;  %v1048_v5 = vld [vmem:[%s1568_s1 + $0x14] ss:$8 sps:$4 sm:$0xff]  }
   0x2   :  { %v1044_v2 = vld [vmem:[%s1568_s1 + $0x104] ss:$8 sps:$4 sm:$0xff]   ;;  %632 = vmatprep.subr.bf16.mxu1 %v1042_v0  ;;  %v1047_v4 = vld [vmem:[%s1568_s1 + $0x100] ss:$8 sps:$4 sm:$0xff]   ;;  %v1050_v6 = vld [vmem:[%s1568_s1 + $0x114] ss:$8 sps:$4 sm:$0xff]  }
   0x3   :  { %705 = vmatprep.subr.bf16.mxu0 %v1044_v2  ;;  %633 = vmatpush1.bf16.msra.mxu1 %v1046_v3  ;;  %v1052_v7 = vld [vmem:[%s1568_s1 + $0x10] ss:$8 sps:$4 sm:$0xff]   ;;  %v1054_v9 = vld [vmem:[%s1568_s1 + $0x24] ss:$8 sps:$4 sm:$0xff]   ;;  %v1058_v11 = vld [vmem:[%s1568_s1 + $0x20] ss:$8 sps:$4 sm:$0xff]  }
   0x4   :  { %706 = vmatpush1.bf16.msra.mxu0 %v1047_v4  ;;  %634 = vmatprep.subr.bf16.mxu1 %v1048_v5  ;;  %v1053_v8 = vld [vmem:[%s1568_s1 + $0x110] ss:$8 sps:$4 sm:$0xff]   ;;  %v1056_v10 = vld [vmem:[%s1568_s1 + $0x124] ss:$8 sps:$4 sm:$0xff]   ;;  %v1059_v12 = vld [vmem:[%s1568_s1 + $0x120] ss:$8 sps:$4 sm:$0xff]  }
   0x5   :  { %707 = vmatprep.subr.bf16.mxu0 %v1050_v6  ;;  %v1060_v13 = vld [vmem:[%s1568_s1 + $0x34] ss:$8 sps:$4 sm:$0xff]   ;;  %v1064_v15 = vld [vmem:[%s1568_s1 + $0x30] ss:$8 sps:$4 sm:$0xff]   ;;  %v1066_v17 = vld [vmem:[%s1568_s1 + $0x44] ss:$8 sps:$4 sm:$0xff]  }
   0x6   :  { %v1062_v14 = vld [vmem:[%s1568_s1 + $0x134] ss:$8 sps:$4 sm:$0xff]   ;;  %v1065_v16 = vld [vmem:[%s1568_s1 + $0x130] ss:$8 sps:$4 sm:$0xff]   ;;  %v1068_v18 = vld [vmem:[%s1568_s1 + $0x144] ss:$8 sps:$4 sm:$0xff]  }
   0x7   :  { %635 = vmatpush1.bf16.msra.mxu1 %v1052_v7  ;;  %v1070_v19 = vld [vmem:[%s1568_s1 + $0x40] ss:$8 sps:$4 sm:$0xff]   ;;  %v1072_v21 = vld [vmem:[%s1568_s1 + $0x54] ss:$8 sps:$4 sm:$0xff]   ;;  %v1076_v23 = vld [vmem:[%s1568_s1 + $0x50] ss:$8 sps:$4 sm:$0xff]  }
   0x8   :  { %708 = vmatpush1.bf16.msra.mxu0 %v1053_v8  ;;  %636 = vmatprep.subr.bf16.mxu1 %v1054_v9  ;;  %v1071_v20 = vld [vmem:[%s1568_s1 + $0x140] ss:$8 sps:$4 sm:$0xff]   ;;  %v1074_v22 = vld [vmem:[%s1568_s1 + $0x154] ss:$8 sps:$4 sm:$0xff]   ;;  %v1077_v24 = vld [vmem:[%s1568_s1 + $0x150] ss:$8 sps:$4 sm:$0xff]  }
   0x9   :  { %709 = vmatprep.subr.bf16.mxu0 %v1056_v10  ;;  %v1078_v25 = vld [vmem:[%s1568_s1 + $0x64] ss:$8 sps:$4 sm:$0xff]   ;;  %v1082_v27 = vld [vmem:[%s1568_s1 + $0x60] ss:$8 sps:$4 sm:$0xff]   ;;  %v1084_v29 = vld [vmem:[%s1568_s1 + $0x74] ss:$8 sps:$4 sm:$0xff]  }
   0xa   :  { %v1080_v26 = vld [vmem:[%s1568_s1 + $0x164] ss:$8 sps:$4 sm:$0xff]   ;;  %v1083_v28 = vld [vmem:[%s1568_s1 + $0x160] ss:$8 sps:$4 sm:$0xff]   ;;  %v1086_v30 = vld [vmem:[%s1568_s1 + $0x174] ss:$8 sps:$4 sm:$0xff]  }
   0xb   :  { %637 = vmatpush1.bf16.msra.mxu1 %v1058_v11  ;;  %v1088_v31 = vld [vmem:[%s1568_s1 + $0x70] ss:$8 sps:$4 sm:$0xff]   ;;  %v1090_v33 = vld [vmem:[%s1568_s1 + $0x84] ss:$8 sps:$4 sm:$0xff]   ;;  %v1094_v35 = vld [vmem:[%s1568_s1 + $0x80] ss:$8 sps:$4 sm:$0xff]  }
   0xc   :  { %710 = vmatpush1.bf16.msra.mxu0 %v1059_v12  ;;  %638 = vmatprep.subr.bf16.mxu1 %v1060_v13  ;;  %v1089_v32 = vld [vmem:[%s1568_s1 + $0x170] ss:$8 sps:$4 sm:$0xff]   ;;  %v1092_v34 = vld [vmem:[%s1568_s1 + $0x184] ss:$8 sps:$4 sm:$0xff]   ;;  %v1095_v36 = vld [vmem:[%s1568_s1 + $0x180] ss:$8 sps:$4 sm:$0xff]  }
   0xd   :  { %711 = vmatprep.subr.bf16.mxu0 %v1062_v14  ;;  %v1096_v37 = vld [vmem:[%s1568_s1 + $0x94] ss:$8 sps:$4 sm:$0xff]   ;;  %v1100_v39 = vld [vmem:[%s1568_s1 + $0x90] ss:$8 sps:$4 sm:$0xff]   ;;  %v1102_v41 = vld [vmem:[%s1568_s1 + $0xa4] ss:$8 sps:$4 sm:$0xff]  }
   0xe   :  { %v1098_v38 = vld [vmem:[%s1568_s1 + $0x194] ss:$8 sps:$4 sm:$0xff]   ;;  %v1101_v40 = vld [vmem:[%s1568_s1 + $0x190] ss:$8 sps:$4 sm:$0xff]   ;;  %v1104_v42 = vld [vmem:[%s1568_s1 + $0x1a4] ss:$8 sps:$4 sm:$0xff]  }
   0xf   :  { %639 = vmatpush1.bf16.msra.mxu1 %v1064_v15  ;;  %v1106_v43 = vld [vmem:[%s1568_s1 + $0xa0] ss:$8 sps:$4 sm:$0xff]   ;;  %v1108_v45 = vld [vmem:[%s1568_s1 + $0xb4] ss:$8 sps:$4 sm:$0xff]   ;;  %v1112_v47 = vld [vmem:[%s1568_s1 + $0xb0] ss:$8 sps:$4 sm:$0xff]  }
  0x10   :  { %712 = vmatpush1.bf16.msra.mxu0 %v1065_v16  ;;  %640 = vmatprep.subr.bf16.mxu1 %v1066_v17  ;;  %v1107_v44 = vld [vmem:[%s1568_s1 + $0x1a0] ss:$8 sps:$4 sm:$0xff]   ;;  %v1110_v46 = vld [vmem:[%s1568_s1 + $0x1b4] ss:$8 sps:$4 sm:$0xff]   ;;  %v1113_v48 = vld [vmem:[%s1568_s1 + $0x1b0] ss:$8 sps:$4 sm:$0xff]  }
  0x11   :  { %713 = vmatprep.subr.bf16.mxu0 %v1068_v18  ;;  %v1114_v49 = vld [vmem:[%s1568_s1 + $0xc4] ss:$8 sps:$4 sm:$0xff]   ;;  %v1118_v53 = vld [vmem:[%s1568_s1 + $0xc0] ss:$8 sps:$4 sm:$0xff]   ;;  %v1120_v55 = vld [vmem:[%s1568_s1 + $0xd4] ss:$8 sps:$4 sm:$0xff]  }
  0x12   :  { %v1140_v50 = vld [vmem:[%s1569_s0 + $0x4] ss:$20 sps:$4 sm:$0xff]   ;;  %v1143_v52 = vld [vmem:[%s1569_s0 + $0xc] ss:$20 sps:$4 sm:$0xff]   ;;  %v1122_v56 = vld [vmem:[%s1568_s1 + $0x1d4] ss:$8 sps:$4 sm:$0xff]  }
  0x13   :  { %641 = vmatpush1.bf16.msra.mxu1 %v1070_v19  ;;  %v1116_v51 = vld [vmem:[%s1568_s1 + $0x1c4] ss:$8 sps:$4 sm:$0xff]   ;;  %664 = vmatprep.mubr.bf16.mxu1 %v1140_v50  ;;  %v1119_v54 = vld [vmem:[%s1568_s1 + $0x1c0] ss:$8 sps:$4 sm:$0xff]   ;;  %v1124_v57 = vld [vmem:[%s1568_s1 + $0xd0] ss:$8 sps:$4 sm:$0xff]  }
  0x14   :  { %714 = vmatpush1.bf16.msra.mxu0 %v1071_v20  ;;  %642 = vmatprep.subr.bf16.mxu1 %v1072_v21  ;;  %v1125_v58 = vld [vmem:[%s1568_s1 + $0x1d0] ss:$8 sps:$4 sm:$0xff]   ;;  %v1126_v59 = vld [vmem:[%s1568_s1 + $0xe4] ss:$8 sps:$4 sm:$0xff]   ;;  %v1130_v61 = vld [vmem:[%s1568_s1 + $0xe0] ss:$8 sps:$4 sm:$0xff]  }
  0x15   :  { %715 = vmatprep.subr.bf16.mxu0 %v1074_v22  ;;  %737 = vmatprep.mubr.bf16.mxu0 %v1143_v52  ;;  %v1128_v60 = vld [vmem:[%s1568_s1 + $0x1e4] ss:$8 sps:$4 sm:$0xff]   ;;  %v1131_v62 = vld [vmem:[%s1568_s1 + $0x1e0] ss:$8 sps:$4 sm:$0xff]   ;;  %v1132_v63 = vld [vmem:[%s1568_s1 + $0xf4] ss:$8 sps:$4 sm:$0xff]  }
  0x16   :  { %v1134_v0 = vld [vmem:[%s1568_s1 + $0x1f4] ss:$8 sps:$4 sm:$0xff]   ;;  %v1136_v2 = vld [vmem:[%s1568_s1 + $0xf0] ss:$8 sps:$4 sm:$0xff]   ;;  %v1146_v4 = vld [vmem:[%s1568_s1 + $0x204] ss:$8 sps:$4 sm:$0xff]  }
  0x17   :  { %643 = vmatpush1.bf16.msra.mxu1 %v1076_v23  ;;  %v1137_v3 = vld [vmem:[%s1568_s1 + $0x1f0] ss:$8 sps:$4 sm:$0xff]   ;;  %v115_v5 = vld [vmem:[%s1570_s2 + $0x20] sm:$0xff]  ;;  %v1141_v7 = vld [vmem:[%s1569_s0 + $0x8] ss:$20 sps:$4 sm:$0xff]  }
  0x18   :  { %716 = vmatpush1.bf16.msra.mxu0 %v1077_v24  ;;  %644 = vmatprep.subr.bf16.mxu1 %v1078_v25  ;;  %v1138_v6 = vld [vmem:[%s1569_s0] ss:$20 sps:$4 sm:$0xff]   ;;  %v1153_v13 = vld [vmem:[%s1568_s1 + $0x210] ss:$8 sps:$4 sm:$0xff]   ;;  %v116_v14 = vld [vmem:[%s1570_s2 + $0x28] sm:$0xff] }
  0x19   :  { %717 = vmatprep.subr.bf16.mxu0 %v1080_v26  ;;  %141 = vperm.xlu0 %1040, %v115_v5   ;;  %v117_v8 = vld [vmem:[%s1570_s2 + $0x30] sm:$0xff]  ;;  %v1144_v9 = vld [vmem:[%s1568_s1 + $0x200] ss:$8 sps:$4 sm:$0xff]   ;;  %v118_v15 = vld [vmem:[%s1570_s2 + $0x38] sm:$0xff] }
  0x1a   :  { %v1147_v10 = vld [vmem:[%s1569_s0 + $0x2c] ss:$20 sps:$4 sm:$0xff]   ;;  %v1149_v11 = vld [vmem:[%s1569_s0 + $0x34] ss:$20 sps:$4 sm:$0xff]   ;;  %151 = vperm.xlu1 %1041, %v117_v8   ;;  %v1152_v18 = vld [vmem:[%s1569_s0 + $0x30] ss:$20 sps:$4 sm:$0xff]  }
  0x1b   :  { %645 = vmatpush1.bf16.msra.mxu1 %v1082_v27  ;;  %v1155_v12 = vld [vmem:[%s1568_s1 + $0x214] ss:$8 sps:$4 sm:$0xff]   ;;  %v1164_v16 = vld [vmem:[%s1568_s1 + $0x224] ss:$8 sps:$4 sm:$0xff]   ;;  %v1162_v21 = vld [vmem:[%s1568_s1 + $0x220] ss:$8 sps:$4 sm:$0xff]  }
  0x1c   :  { %718 = vmatpush1.bf16.msra.mxu0 %v1083_v28  ;;  %646 = vmatprep.subr.bf16.mxu1 %v1084_v29  ;;  %v1151_v17 = vld [vmem:[%s1569_s0 + $0x28] ss:$20 sps:$4 sm:$0xff]   ;;  %v111_v23 = vld [vmem:[%s1570_s2] sm:$0xff]  ;;  %v1171_v25 = vld [vmem:[%s1568_s1 + $0x230] ss:$8 sps:$4 sm:$0xff]  }
  0x1d   :  { %719 = vmatprep.subr.bf16.mxu0 %v1086_v30  ;;  %146 = vperm.xlu0 %1040, %v116_v14   ;;  %v1156_v19 = vld [vmem:[%s1569_s0 + $0x54] ss:$20 sps:$4 sm:$0xff]   ;;  %v1158_v20 = vld [vmem:[%s1569_s0 + $0x5c] ss:$20 sps:$4 sm:$0xff]   ;;  %v1161_v27 = vld [vmem:[%s1569_s0 + $0x58] ss:$20 sps:$4 sm:$0xff]  }
  0x1e   :  { %156 = vperm.xlu1 %1041, %v118_v15   ;;  %v1173_v22 = vld [vmem:[%s1568_s1 + $0x234] ss:$8 sps:$4 sm:$0xff]   ;;  %v112_v24 = vld [vmem:[%s1570_s2 + $0x8] sm:$0xff]  ;;  %v1160_v26 = vld [vmem:[%s1569_s0 + $0x50] ss:$20 sps:$4 sm:$0xff]  }
  0x1f   :  { %647 = vmatpush1.bf16.msra.mxu1 %v1088_v31  ;;  %v1165_v28 = vld [vmem:[%s1569_s0 + $0x7c] ss:$20 sps:$4 sm:$0xff]   ;;  %v1167_v29 = vld [vmem:[%s1569_s0 + $0x84] ss:$20 sps:$4 sm:$0xff]  }
  0x20   :  { %720 = vmatpush1.bf16.msra.mxu0 %v1089_v32  ;;  %648 = vmatprep.subr.bf16.mxu1 %v1090_v33  ;;  %v113_v30 = vld [vmem:[%s1570_s2 + $0x10] sm:$0xff]  ;;  %v114_v31 = vld [vmem:[%s1570_s2 + $0x18] sm:$0xff] }
  0x21   :  { %721 = vmatprep.subr.bf16.mxu0 %v1092_v34  ;;  %121 = vperm.xlu0 %1040, %v111_v23   ;;  %v1169_v32 = vld [vmem:[%s1569_s0 + $0x78] ss:$20 sps:$4 sm:$0xff]   ;;  %v1170_v33 = vld [vmem:[%s1569_s0 + $0x80] ss:$20 sps:$4 sm:$0xff]   ;;  %v1174_v34 = vld [vmem:[%s1569_s0 + $0x10] ss:$20 sps:$4 sm:$0xff]  }
  0x22   :  { %126 = vperm.xlu1 %1041, %v112_v24  }
  0x23   :  { %649 = vmatpush1.bf16.msra.mxu1 %v1094_v35  ;;  %v1175_v35 = vld [vmem:[%s1569_s0 + $0x60] ss:$20 sps:$4 sm:$0xff]  }
  0x24   :  { %722 = vmatpush1.bf16.msra.mxu0 %v1095_v36  ;;  %650 = vmatprep.subr.bf16.mxu1 %v1096_v37  ;;  %v1176_v36 = vld [vmem:[%s1569_s0 + $0x38] ss:$20 sps:$4 sm:$0xff]   ;;  %v1177_v37 = vld [vmem:[%s1569_s0 + $0x88] ss:$20 sps:$4 sm:$0xff]  }
  0x25   :  { %723 = vmatprep.subr.bf16.mxu0 %v1098_v38  ;;  %131 = vperm.xlu0 %1040, %v113_v30  }
  0x26   :  { %136 = vperm.xlu1 %1041, %v114_v31  }
  0x27   :  { %651 = vmatpush1.bf16.msra.mxu1 %v1100_v39 }
  0x28   :  { %724 = vmatpush1.bf16.msra.mxu0 %v1101_v40  ;;  %652 = vmatprep.subr.bf16.mxu1 %v1102_v41 }
  0x29   :  { %725 = vmatprep.subr.bf16.mxu0 %v1104_v42 }
  0x2b   :  { %653 = vmatpush1.bf16.msra.mxu1 %v1106_v43 }
  0x2c   :  { %726 = vmatpush1.bf16.msra.mxu0 %v1107_v44  ;;  %654 = vmatprep.subr.bf16.mxu1 %v1108_v45 }
  0x2d   :  { %727 = vmatprep.subr.bf16.mxu0 %v1110_v46 }
  0x2f   :  { %655 = vmatpush1.bf16.msra.mxu1 %v1112_v47 }
  0x30   :  { %728 = vmatpush1.bf16.msra.mxu0 %v1113_v48  ;;  %656 = vmatprep.subr.bf16.mxu1 %v1114_v49 }
  0x31   :  { %729 = vmatprep.subr.bf16.mxu0 %v1116_v51 }
  0x33   :  { %657 = vmatpush1.bf16.msra.mxu1 %v1118_v53 }
  0x34   :  { %730 = vmatpush1.bf16.msra.mxu0 %v1119_v54  ;;  %658 = vmatprep.subr.bf16.mxu1 %v1120_v55 }
  0x35   :  { %731 = vmatprep.subr.bf16.mxu0 %v1122_v56 }
  0x37   :  { %659 = vmatpush1.bf16.msra.mxu1 %v1124_v57 }
  0x38   :  { %732 = vmatpush1.bf16.msra.mxu0 %v1125_v58  ;;  %660 = vmatprep.subr.bf16.mxu1 %v1126_v59 }
  0x39   :  { %733 = vmatprep.subr.bf16.mxu0 %v1128_v60 }
  0x3b   :  { %661 = vmatpush1.bf16.msra.mxu1 %v1130_v61 }
  0x3c   :  { %734 = vmatpush1.bf16.msra.mxu0 %v1131_v62  ;;  %662 = vmatprep.subr.bf16.mxu1 %v1132_v63 }
  0x3d   :  { %735 = vmatprep.subr.bf16.mxu0 %v1134_v0 }
  0x3f   :  { %663 = vmatpush1.bf16.msra.mxu1 %v1136_v2 }
  0x40   :  { %736 = vmatpush1.bf16.msra.mxu0 %v1137_v3  ;;  %983 = vmatprep.subr.bf16.mxu1 %v1146_v4 }
  0x41   :  { %778 = vmatprep.subr.bf16.mxu0 %v1146_v4 }
  0x42   :  { %665 = vmatmul.mubr.bf16.vlgmr.msra.gmra.mrb[0].mxu1 %v1138_v6 }
  0x43   :  { %738 = vmatmul.mubr.bf16.vlgmr.msra.gmra.mrb[0].mxu0 %v1141_v7  ;;  %987 = vmatpush1.bf16.msra.mxu1 %v1144_v9 }
  0x44   :  { %779 = vmatpush1.bf16.msra.mxu0 %v1144_v9  ;;  %674 = vmatprep.mubr.bf16.mxu1 %v1147_v10 }
  0x45   :  { %747 = vmatprep.mubr.bf16.mxu0 %v1149_v11  ;;  %780 = vmatprep.subr.bf16.mxu0 %v1155_v12 }
  0x46   :  { %984 = vmatprep.subr.bf16.mxu1 %v1155_v12 }
  0x47   :  { %988 = vmatpush1.bf16.msra.mxu1 %v1153_v13 }
  0x48   :  { %781 = vmatpush1.bf16.msra.mxu0 %v1153_v13  ;;  %985 = vmatprep.subr.bf16.mxu1 %v1164_v16 }
  0x49   :  { %782 = vmatprep.subr.bf16.mxu0 %v1164_v16 }
  0x4a   :  { %675 = vmatmul.mubr.bf16.gmra.mrb[4].mxu1 %v1151_v17 }
  0x4b   :  { %748 = vmatmul.mubr.bf16.gmra.mrb[4].mxu0 %v1152_v18  ;;  %684 = vmatprep.mubr.bf16.mxu1 %v1156_v19 }
  0x4c   :  { %757 = vmatprep.mubr.bf16.mxu0 %v1158_v20  ;;  %783 = vmatpush1.bf16.msra.mxu0 %v1162_v21 }
  0x4d   :  { %989 = vmatpush1.bf16.msra.mxu1 %v1162_v21  ;;  %784 = vmatprep.subr.bf16.mxu0 %v1173_v22 }
  0x4e   :  { %986 = vmatprep.subr.bf16.mxu1 %v1173_v22 }
  0x50   :  { %785 = vmatpush1.bf16.msra.mxu0 %v1171_v25 }
  0x51   :  { %990 = vmatpush1.bf16.msra.mxu1 %v1171_v25 }
  0x52   :  { %685 = vmatmul.mubr.bf16.gmra.mrb[8].mxu1 %v1160_v26 }
  0x53   :  { %758 = vmatmul.mubr.bf16.gmra.mrb[8].mxu0 %v1161_v27  ;;  %694 = vmatprep.mubr.bf16.mxu1 %v1165_v28 }
  0x54   :  { %767 = vmatprep.mubr.bf16.mxu0 %v1167_v29 }
  0x5a   :  { %695 = vmatmul.mubr.bf16.gmra.mrb[12].mxu1 %v1169_v32 }
  0x5b   :  { %768 = vmatmul.mubr.bf16.gmra.mrb[12].mxu0 %v1170_v33  ;;  %830 = vmatprep.mubr.bf16.mxu1 %v1178_v1 }
  0x5c   :  { %810 = vmatprep.mubr.bf16.mxu0 %v1178_v1 }
  0x62   :  { %981 = vmatmul.mubr.msk.bf16.vlgmr.msra.gmra.mrb[16].mxu1 %vm619_vm0, %v1175_v35 }
  0x63   :  { %979 = vmatmul.mubr.msk.bf16.vlgmr.msra.gmra.mrb[0].mxu0 %vm619_vm0, %v1174_v34  ;;  %840 = vmatprep.mubr.bf16.mxu1 %v1178_v1 }
  0x64   :  { %820 = vmatprep.mubr.bf16.mxu0 %v1178_v1 }
  0x6a   :  { %982 = vmatmul.mubr.msk.bf16.gmra.mrb[20].mxu1 %vm619_vm0, %v1177_v37 }
  0x6b   :  { %980 = vmatmul.mubr.msk.bf16.gmra.mrb[4].mxu0 %vm619_vm0, %v1176_v36 }
  0x98   :  { %v142_v43 = vpop.permute.xlu0 %141 }
  0x99   :  { %v152_v46 = vpop.permute.xlu1 %151 }
  0x9c   :  { %v147_v47 = vpop.permute.xlu0 %146 }
  0x9d   :  { %v157_v0 = vpop.permute.xlu1 %156 }
  0xa0   :  { %v122_v14 = vpop.permute.xlu0 %121 }
  0xa1   :  { %v127_v18 = vpop.permute.xlu1 %126 }
 0x115   :  { %v666_v38 = vpop.f32.mrb[0].mxu1 }
 0x116   :  { %v668_v39 = vpop.f32.mrb[1].mxu1  ;;  %v667_v20 = vadd.f32 %v666_v38, %v122_v14  ;;  %v132_v38 = vpop.permute.xlu0 %131 }
 0x117   :  { %v670_v40 = vpop.f32.mrb[2].mxu1  ;;  %v669_v21 = vadd.f32 %v668_v39, %v122_v14 }
 0x118   :  { %v672_v41 = vpop.f32.mrb[3].mxu1  ;;  %v671_v24 = vadd.f32 %v670_v40, %v127_v18 }
 0x119   :  { %v673_v29 = vadd.f32 %v672_v41, %v127_v18 }
 0x11d   :  { %v1505_v42 = vpop.f32.mrb[4].mxu1 }
 0x11e   :  { %v1507_v44 = vpop.f32.mrb[5].mxu1 }
 0x11f   :  { %v1509_v1 = vpop.f32.mrb[6].mxu1 }
 0x120   :  { %v1511_v45 = vpop.f32.mrb[7].mxu1 }
 0x125   :  { %v686_v48 = vpop.f32.mrb[8].mxu1 }
 0x126   :  { %v759_v49 = vpop.f32.mrb[8].mxu0  ;;  %v687_v50 = vadd.f32 %v686_v48, %v142_v43  ;;  %v688_v51 = vpop.f32.mrb[9].mxu1 }
 0x127   :  { %v761_v52 = vpop.f32.mrb[9].mxu0  ;;  %v689_v53 = vadd.f32 %v688_v51, %v142_v43  ;;  %v690_v54 = vpop.f32.mrb[10].mxu1 }
 0x128   :  { %v763_v55 = vpop.f32.mrb[10].mxu0  ;;  %v760_v56 = vadd.f32 %v759_v49, %v687_v50  ;;  %v691_v57 = vadd.f32 %v690_v54, %v147_v47  ;;  %v692_v58 = vpop.f32.mrb[11].mxu1  ;;  %v679_v54 = vadd.f32 %v1507_v44, %v132_v38 }
 0x129   :  { %v765_v59 = vpop.f32.mrb[11].mxu0  ;;  %v762_v60 = vadd.f32 %v761_v52, %v689_v53  ;;  %v693_v61 = vadd.f32 %v692_v58, %v147_v47  ;;  %v137_v50 = vpop.permute.xlu1 %136  ;;  %v677_v53 = vadd.f32 %v1505_v42, %v132_v38 }
 0x12a   :  { %v764_v62 = vadd.f32 %v763_v55, %v691_v57 }
 0x12b   :  { %v766_v63 = vadd.f32 %v765_v59, %v693_v61  ;;  %v683_v61 = vadd.f32 %v1511_v45, %v137_v50 }
 0x12d   :  { %v696_v2 = vpop.f32.mrb[12].mxu1 }
 0x12e   :  { %v769_v3 = vpop.f32.mrb[12].mxu0  ;;  %v697_v4 = vadd.f32 %v696_v2, %v152_v46  ;;  %v698_v5 = vpop.f32.mrb[13].mxu1 }
 0x12f   :  { %v771_v6 = vpop.f32.mrb[13].mxu0  ;;  %v699_v7 = vadd.f32 %v698_v5, %v152_v46  ;;  %v700_v8 = vpop.f32.mrb[14].mxu1 }
 0x130   :  { %v773_v9 = vpop.f32.mrb[14].mxu0  ;;  %v770_v10 = vadd.f32 %v769_v3, %v697_v4  ;;  %v701_v11 = vadd.f32 %v700_v8, %v157_v0  ;;  %v702_v12 = vpop.f32.mrb[15].mxu1 }
 0x131   :  { %v775_v13 = vpop.f32.mrb[15].mxu0  ;;  %v772_v15 = vadd.f32 %v771_v6, %v699_v7  ;;  %v703_v16 = vadd.f32 %v702_v12, %v157_v0 }
 0x132   :  { %v774_v17 = vadd.f32 %v773_v9, %v701_v11 }
 0x133   :  { %v1513_v19 = vadd.f32 %v775_v13, %v703_v16 }
 0x135   :  { %v832_v23 = vpop.f32.mrb[16].mxu1 }
 0x136   :  { %v812_v22 = vpop.f32.mrb[0].mxu0  ;;  %v833_v26 = vadd.f32 %v832_v23, %v760_v56  ;;  %v834_v28 = vpop.f32.mrb[17].mxu1  ;;  %v681_v56 = vadd.f32 %v1509_v1, %v137_v50 }
 0x137   :  { %v992_v25 = vadd.f32 %v812_v22, %v667_v20  ;;  %v814_v27 = vpop.f32.mrb[1].mxu0  ;;  %v835_v31 = vadd.f32 %v834_v28, %v762_v60  ;;  %v836_v33 = vpop.f32.mrb[18].mxu1 }
 0x138   :  { %v994_v30 = vadd.f32 %v814_v27, %v669_v21  ;;  %v816_v32 = vpop.f32.mrb[2].mxu0  ;;  %v859_v35 = vmax.f32 %v833_v26, 0.0  ;;  %v837_v37 = vadd.f32 %v836_v33, %v764_v62  ;;  %v838_v46 = vpop.f32.mrb[19].mxu1 }
 0x139   :  { %v851_v34 = vmax.f32 %v992_v25, 0.0  ;;  %v996_v36 = vadd.f32 %v816_v32, %v671_v24  ;;  %v818_v43 = vpop.f32.mrb[3].mxu0  ;;  %v860_v47 = vmax.f32 %v835_v31, 0.0  ;;  %v839_v40 = vadd.f32 %v838_v46, %v766_v63 }
 0x13a   :  { %v852_v39 = vmax.f32 %v994_v30, 0.0  ;;  %v998_v48 = vadd.f32 %v818_v43, %v673_v29  ;;  %875 = vst [vmem:[%s1571_s3 + $0x40] sm:$0xff] %v859_v35  ;;  %v861_v49 = vmax.f32 %v837_v37, 0.0 }
 0x13b   :  { %867 = vst [vmem:[%s1571_s3] sm:$0xff] %v851_v34  ;;  %v853_v41 = vmax.f32 %v996_v36, 0.0  ;;  %876 = vst [vmem:[%s1571_s3 + $0x48] sm:$0xff] %v860_v47  ;;  %v862_v52 = vmax.f32 %v839_v40, 0.0 }
 0x13c   :  { %868 = vst [vmem:[%s1571_s3 + $0x8] sm:$0xff] %v852_v39  ;;  %v854_v51 = vmax.f32 %v998_v48, 0.0  ;;  %877 = vst [vmem:[%s1571_s3 + $0x50] sm:$0xff] %v861_v49 }
 0x13d   :  { %869 = vst [vmem:[%s1571_s3 + $0x10] sm:$0xff] %v853_v41  ;;  %878 = vst [vmem:[%s1571_s3 + $0x58] sm:$0xff] %v862_v52  ;;  %v842_v42 = vpop.f32.mrb[20].mxu1 }
 0x13e   :  { %870 = vst [vmem:[%s1571_s3 + $0x18] sm:$0xff] %v854_v51  ;;  %v822_v55 = vpop.f32.mrb[4].mxu0  ;;  %v843_v58 = vadd.f32 %v842_v42, %v770_v10  ;;  %v844_v60 = vpop.f32.mrb[21].mxu1 }
 0x13f   :  { %v1000_v57 = vadd.f32 %v822_v55, %v677_v53  ;;  %v824_v59 = vpop.f32.mrb[5].mxu0  ;;  %v845_v44 = vadd.f32 %v844_v60, %v772_v15  ;;  %v846_v0 = vpop.f32.mrb[22].mxu1 }
 0x140   :  { %v1002_v62 = vadd.f32 %v824_v59, %v679_v54  ;;  %v826_v63 = vpop.f32.mrb[6].mxu0  ;;  %v863_v3 = vmax.f32 %v843_v58, 0.0  ;;  %v847_v5 = vadd.f32 %v846_v0, %v774_v17  ;;  %v848_v7 = vpop.f32.mrb[23].mxu1 }
 0x141   :  { %v855_v2 = vmax.f32 %v1000_v57, 0.0  ;;  %v1004_v4 = vadd.f32 %v826_v63, %v681_v56  ;;  %v828_v6 = vpop.f32.mrb[7].mxu0  ;;  %v864_v9 = vmax.f32 %v845_v44, 0.0  ;;  %v849_v1 = vadd.f32 %v848_v7, %v1513_v19 }
 0x142   :  { %v856_v8 = vmax.f32 %v1002_v62, 0.0  ;;  %v1006_v11 = vadd.f32 %v828_v6, %v683_v61  ;;  %879 = vst [vmem:[%s1571_s3 + $0x60] sm:$0xff] %v863_v3  ;;  %v865_v10 = vmax.f32 %v847_v5, 0.0 }
 0x143   :  { %871 = vst [vmem:[%s1571_s3 + $0x20] sm:$0xff] %v855_v2  ;;  %v857_v45 = vmax.f32 %v1004_v4, 0.0  ;;  %880 = vst [vmem:[%s1571_s3 + $0x68] sm:$0xff] %v864_v9  ;;  %v866_v13 = vmax.f32 %v849_v1, 0.0 }
 0x144   :  { %872 = vst [vmem:[%s1571_s3 + $0x28] sm:$0xff] %v856_v8  ;;  %v858_v12 = vmax.f32 %v1006_v11, 0.0  ;;  %881 = vst [vmem:[%s1571_s3 + $0x70] sm:$0xff] %v865_v10 }
 0x145   :  { %873 = vst [vmem:[%s1571_s3 + $0x30] sm:$0xff] %v857_v45  ;;  %882 = vst [vmem:[%s1571_s3 + $0x78] sm:$0xff] %v866_v13 }
 0x146   :  { %874 = vst [vmem:[%s1571_s3 + $0x38] sm:$0xff] %v858_v12 }

// kernel: tile.15
= control target key start
LH: loop header
LB: loop body
LE: loop exit
PB: predicated region body
PF: predicated region fallthrough
CT: control target
= control target key end

     0   :  { %s22_s0 = inlined_call_operand.vmem [shape: f32[32], index: 0, kind: input, shape index: {}]   ;;  %s23_s1 = inlined_call_operand.vmem [shape: f32[4,32], index: 1, kind: output, shape index: {}]  }
   0x1   :  { %v4_v0 = vld [vmem:[%s22_s0] ss:$0 sm:$0xff] }
   0x2   :  { %5 = vst [vmem:[%s23_s1] sm:$0xf] %v4_v0 }

// kernel: tile.0
= control target key start
LH: loop header
LB: loop body
LE: loop exit
PB: predicated region body
PF: predicated region fallthrough
CT: control target
= control target key end

     0   :  { %s546_s8 = smov 125   ;;  %s547_s9 = smov 126   ;;  %vm7_vm0 = vcmask 7168   ;;  %s1101_s0 = inlined_call_operand.vmem [shape: f32[4,32], index: 0, kind: input, shape index: {}]   ;;  %s1102_s1 = inlined_call_operand.vmem [shape: f32[128,1], index: 1, kind: output, shape index: {}]  }
   0x1   :  { %v4_v0 = vld [vmem:[%s1101_s0] sm:$0xf]  ;;  %s545_s0 = smov 127   ;;  %s548_s10 = smov 124  }
   0x2   :  { %5 = vst [vmem:[#allocation0] sm:$0xf] %v4_v0  ;;  %s549_s11 = smov 123   ;;  %s550_s12 = smov 122  }
   0x3   :  { %s551_s13 = smov 121   ;;  %s552_s14 = smov 120  }
   0x4   :  { %s553_s15 = smov 119   ;;  %s554_s16 = smov 118  }
   0x5   :  { %s555_s17 = smov 117   ;;  %s556_s18 = smov 116  }
   0x6   :  { %s557_s19 = smov 115   ;;  %s558_s20 = smov 114  }
   0x7   :  { %s559_s21 = smov 113   ;;  %s560_s22 = smov 112  }
   0x8   :  { %s561_s23 = smov 111   ;;  %s562_s24 = smov 110  }
   0x9   :  { %v15_v1 = vld [vmem:[#allocation0] sm:$0xf]   ;;  %s563_s25 = smov 109   ;;  %s564_s26 = smov 108  }
   0xa   :  { %v39_v2 = vld [vmem:[#allocation0] sm:$0xf]   ;;  %16 = vrot.lane.b32.xlu0 %v15_v1, %s545_s0  ;;  %s565_s27 = smov 107   ;;  %s566_s28 = smov 106  }
   0xb   :  { %40 = vrot.lane.b32.xlu1 %v39_v2, %s546_s8  ;;  %v27_v3 = vld [vmem:[#allocation0] sm:$0xf]   ;;  %s567_s29 = smov 105   ;;  %s568_s30 = smov 104  }
   0xc   :  { %v51_v4 = vld [vmem:[#allocation0] sm:$0xf]  }
   0xd   :  { %v63_v5 = vld [vmem:[#allocation0] sm:$0xf]  }
   0xe   :  { %28 = vrot.lane.b32.xlu0 %v27_v3, %s547_s9  ;;  %v75_v6 = vld [vmem:[#allocation0] sm:$0xf]   ;;  %s569_s9 = smov 103  }
   0xf   :  { %52 = vrot.lane.b32.xlu1 %v51_v4, %s548_s10  ;;  %v87_v7 = vld [vmem:[#allocation0] sm:$0xf]   ;;  %s570_s10 = smov 102  }
  0x10   :  { %v99_v8 = vld [vmem:[#allocation0] sm:$0xf]  }
  0x11   :  { %v111_v9 = vld [vmem:[#allocation0] sm:$0xf]  }
  0x12   :  { %64 = vrot.lane.b32.xlu0 %v63_v5, %s549_s11  ;;  %v123_v10 = vld [vmem:[#allocation0] sm:$0xf]   ;;  %s571_s11 = smov 101  }
  0x13   :  { %76 = vrot.lane.b32.xlu1 %v75_v6, %s550_s12  ;;  %v135_v11 = vld [vmem:[#allocation0] sm:$0xf]   ;;  %s572_s12 = smov 100  }
  0x14   :  { %v147_v12 = vld [vmem:[#allocation0] sm:$0xf]  }
  0x15   :  { %v159_v13 = vld [vmem:[#allocation0] sm:$0xf]  }
  0x16   :  { %88 = vrot.lane.b32.xlu0 %v87_v7, %s551_s13  ;;  %v171_v14 = vld [vmem:[#allocation0] sm:$0xf]   ;;  %s573_s13 = smov 99  }
  0x17   :  { %100 = vrot.lane.b32.xlu1 %v99_v8, %s552_s14  ;;  %v183_v15 = vld [vmem:[#allocation0] sm:$0xf]   ;;  %s574_s14 = smov 98  }
  0x18   :  { %v195_v16 = vld [vmem:[#allocation0] sm:$0xf]  }
  0x19   :  { %v207_v17 = vld [vmem:[#allocation0] sm:$0xf]  }
  0x1a   :  { %112 = vrot.lane.b32.xlu0 %v111_v9, %s553_s15  ;;  %v219_v18 = vld [vmem:[#allocation0] sm:$0xf]   ;;  %s575_s15 = smov 97  }
  0x1b   :  { %124 = vrot.lane.b32.xlu1 %v123_v10, %s554_s16  ;;  %v231_v19 = vld [vmem:[#allocation0] sm:$0xf]  }
  0x1c   :  { %v243_v20 = vld [vmem:[#allocation0] sm:$0xf]  }
  0x1d   :  { %v255_v21 = vld [vmem:[#allocation0] sm:$0xf]  }
  0x1e   :  { %136 = vrot.lane.b32.xlu0 %v135_v11, %s555_s17  ;;  %v267_v22 = vld [vmem:[#allocation0] sm:$0xf]  }
  0x1f   :  { %148 = vrot.lane.b32.xlu1 %v147_v12, %s556_s18  ;;  %v279_v23 = vld [vmem:[#allocation0] sm:$0xf]  }
  0x20   :  { %v291_v24 = vld [vmem:[#allocation0] sm:$0xf]  }
  0x21   :  { %v303_v25 = vld [vmem:[#allocation0] sm:$0xf]  }
  0x22   :  { %160 = vrot.lane.b32.xlu0 %v159_v13, %s557_s19  ;;  %v315_v26 = vld [vmem:[#allocation0] sm:$0xf]  }
  0x23   :  { %172 = vrot.lane.b32.xlu1 %v171_v14, %s558_s20  ;;  %v6_v27 = vld [vmem:[#allocation0] sm:$0xf]  }
  0x24   :  { %8 = vst.msk [vmem:[%s1102_s1] sm:$0x1] %vm7_vm0, %v6_v27   ;;  %387 = vst.msk [vmem:[%s1102_s1 + $0x1f] sm:$0x2] %vm7_vm0, %v6_v27   ;;  %v327_v28 = vld [vmem:[#allocation0] sm:$0xf]  }
  0x25   :  { %388 = vst.msk [vmem:[%s1102_s1 + $0x3e] sm:$0x4] %vm7_vm0, %v6_v27   ;;  %389 = vst.msk [vmem:[%s1102_s1 + $0x5d] sm:$0x8] %vm7_vm0, %v6_v27   ;;  %v339_v29 = vld [vmem:[#allocation0] sm:$0xf]  }
  0x26   :  { %184 = vrot.lane.b32.xlu0 %v183_v15, %s559_s21  ;;  %v351_v30 = vld [vmem:[#allocation0] sm:$0xf]  }
  0x27   :  { %196 = vrot.lane.b32.xlu1 %v195_v16, %s560_s22  ;;  %v363_v31 = vld [vmem:[#allocation0] sm:$0xf]  }
  0x28   :  { %v375_v32 = vld [vmem:[#allocation0] sm:$0xf]  }
  0x2a   :  { %208 = vrot.lane.b32.xlu0 %v207_v17, %s561_s23 }
  0x2b   :  { %220 = vrot.lane.b32.xlu1 %v219_v18, %s562_s24 }
  0x2e   :  { %232 = vrot.lane.b32.xlu0 %v231_v19, %s563_s25 }
  0x2f   :  { %244 = vrot.lane.b32.xlu1 %v243_v20, %s564_s26 }
  0x32   :  { %256 = vrot.lane.b32.xlu0 %v255_v21, %s565_s27 }
  0x33   :  { %268 = vrot.lane.b32.xlu1 %v267_v22, %s566_s28 }
  0x36   :  { %280 = vrot.lane.b32.xlu0 %v279_v23, %s567_s29 }
  0x37   :  { %292 = vrot.lane.b32.xlu1 %v291_v24, %s568_s30 }
  0x3a   :  { %304 = vrot.lane.b32.xlu0 %v303_v25, %s569_s9 }
  0x3b   :  { %316 = vrot.lane.b32.xlu1 %v315_v26, %s570_s10 }
  0x3e   :  { %328 = vrot.lane.b32.xlu0 %v327_v28, %s571_s11 }
  0x3f   :  { %340 = vrot.lane.b32.xlu1 %v339_v29, %s572_s12 }
  0x42   :  { %352 = vrot.lane.b32.xlu0 %v351_v30, %s573_s13 }
  0x43   :  { %364 = vrot.lane.b32.xlu1 %v363_v31, %s574_s14 }
  0x46   :  { %376 = vrot.lane.b32.xlu0 %v375_v32, %s575_s15 }
  0x7c   :  { %v17_v33 = vpop.permute.xlu0 %16  }
  0x7d   :  { %v41_v34 = vpop.permute.xlu1 %40   ;;  %390 = vst.msk [vmem:[%s1102_s1 + $0x1] sm:$0x1] %vm7_vm0, %v17_v33   ;;  %391 = vst.msk [vmem:[%s1102_s1 + $0x20] sm:$0x2] %vm7_vm0, %v17_v33  }
  0x7e   :  { %392 = vst.msk [vmem:[%s1102_s1 + $0x3f] sm:$0x4] %vm7_vm0, %v17_v33   ;;  %393 = vst.msk [vmem:[%s1102_s1 + $0x5e] sm:$0x8] %vm7_vm0, %v17_v33  }
  0x7f   :  { %398 = vst.msk [vmem:[%s1102_s1 + $0x3] sm:$0x1] %vm7_vm0, %v41_v34   ;;  %399 = vst.msk [vmem:[%s1102_s1 + $0x22] sm:$0x2] %vm7_vm0, %v41_v34  }
  0x80   :  { %400 = vst.msk [vmem:[%s1102_s1 + $0x41] sm:$0x4] %vm7_vm0, %v41_v34   ;;  %401 = vst.msk [vmem:[%s1102_s1 + $0x60] sm:$0x8] %vm7_vm0, %v41_v34   ;;  %v29_v35 = vpop.permute.xlu0 %28  }
  0x81   :  { %v53_v36 = vpop.permute.xlu1 %52   ;;  %394 = vst.msk [vmem:[%s1102_s1 + $0x2] sm:$0x1] %vm7_vm0, %v29_v35   ;;  %395 = vst.msk [vmem:[%s1102_s1 + $0x21] sm:$0x2] %vm7_vm0, %v29_v35  }
  0x82   :  { %396 = vst.msk [vmem:[%s1102_s1 + $0x40] sm:$0x4] %vm7_vm0, %v29_v35   ;;  %397 = vst.msk [vmem:[%s1102_s1 + $0x5f] sm:$0x8] %vm7_vm0, %v29_v35  }
  0x83   :  { %402 = vst.msk [vmem:[%s1102_s1 + $0x4] sm:$0x1] %vm7_vm0, %v53_v36   ;;  %403 = vst.msk [vmem:[%s1102_s1 + $0x23] sm:$0x2] %vm7_vm0, %v53_v36  }
  0x84   :  { %404 = vst.msk [vmem:[%s1102_s1 + $0x42] sm:$0x4] %vm7_vm0, %v53_v36   ;;  %405 = vst.msk [vmem:[%s1102_s1 + $0x61] sm:$0x8] %vm7_vm0, %v53_v36   ;;  %v65_v37 = vpop.permute.xlu0 %64  }
  0x85   :  { %v77_v38 = vpop.permute.xlu1 %76   ;;  %406 = vst.msk [vmem:[%s1102_s1 + $0x5] sm:$0x1] %vm7_vm0, %v65_v37   ;;  %407 = vst.msk [vmem:[%s1102_s1 + $0x24] sm:$0x2] %vm7_vm0, %v65_v37  }
  0x86   :  { %408 = vst.msk [vmem:[%s1102_s1 + $0x43] sm:$0x4] %vm7_vm0, %v65_v37   ;;  %409 = vst.msk [vmem:[%s1102_s1 + $0x62] sm:$0x8] %vm7_vm0, %v65_v37  }
  0x87   :  { %410 = vst.msk [vmem:[%s1102_s1 + $0x6] sm:$0x1] %vm7_vm0, %v77_v38   ;;  %411 = vst.msk [vmem:[%s1102_s1 + $0x25] sm:$0x2] %vm7_vm0, %v77_v38  }
  0x88   :  { %412 = vst.msk [vmem:[%s1102_s1 + $0x44] sm:$0x4] %vm7_vm0, %v77_v38   ;;  %413 = vst.msk [vmem:[%s1102_s1 + $0x63] sm:$0x8] %vm7_vm0, %v77_v38   ;;  %v89_v39 = vpop.permute.xlu0 %88  }
  0x89   :  { %v101_v40 = vpop.permute.xlu1 %100   ;;  %414 = vst.msk [vmem:[%s1102_s1 + $0x7] sm:$0x1] %vm7_vm0, %v89_v39   ;;  %415 = vst.msk [vmem:[%s1102_s1 + $0x26] sm:$0x2] %vm7_vm0, %v89_v39  }
  0x8a   :  { %416 = vst.msk [vmem:[%s1102_s1 + $0x45] sm:$0x4] %vm7_vm0, %v89_v39   ;;  %417 = vst.msk [vmem:[%s1102_s1 + $0x64] sm:$0x8] %vm7_vm0, %v89_v39  }
  0x8b   :  { %418 = vst.msk [vmem:[%s1102_s1 + $0x8] sm:$0x1] %vm7_vm0, %v101_v40   ;;  %419 = vst.msk [vmem:[%s1102_s1 + $0x27] sm:$0x2] %vm7_vm0, %v101_v40  }
  0x8c   :  { %420 = vst.msk [vmem:[%s1102_s1 + $0x46] sm:$0x4] %vm7_vm0, %v101_v40   ;;  %421 = vst.msk [vmem:[%s1102_s1 + $0x65] sm:$0x8] %vm7_vm0, %v101_v40   ;;  %v113_v41 = vpop.permute.xlu0 %112  }
  0x8d   :  { %v125_v42 = vpop.permute.xlu1 %124   ;;  %422 = vst.msk [vmem:[%s1102_s1 + $0x9] sm:$0x1] %vm7_vm0, %v113_v41   ;;  %423 = vst.msk [vmem:[%s1102_s1 + $0x28] sm:$0x2] %vm7_vm0, %v113_v41  }
  0x8e   :  { %424 = vst.msk [vmem:[%s1102_s1 + $0x47] sm:$0x4] %vm7_vm0, %v113_v41   ;;  %425 = vst.msk [vmem:[%s1102_s1 + $0x66] sm:$0x8] %vm7_vm0, %v113_v41  }
  0x8f   :  { %426 = vst.msk [vmem:[%s1102_s1 + $0xa] sm:$0x1] %vm7_vm0, %v125_v42   ;;  %427 = vst.msk [vmem:[%s1102_s1 + $0x29] sm:$0x2] %vm7_vm0, %v125_v42  }
  0x90   :  { %428 = vst.msk [vmem:[%s1102_s1 + $0x48] sm:$0x4] %vm7_vm0, %v125_v42   ;;  %429 = vst.msk [vmem:[%s1102_s1 + $0x67] sm:$0x8] %vm7_vm0, %v125_v42   ;;  %v137_v43 = vpop.permute.xlu0 %136  }
  0x91   :  { %v149_v44 = vpop.permute.xlu1 %148   ;;  %430 = vst.msk [vmem:[%s1102_s1 + $0xb] sm:$0x1] %vm7_vm0, %v137_v43   ;;  %431 = vst.msk [vmem:[%s1102_s1 + $0x2a] sm:$0x2] %vm7_vm0, %v137_v43  }
  0x92   :  { %432 = vst.msk [vmem:[%s1102_s1 + $0x49] sm:$0x4] %vm7_vm0, %v137_v43   ;;  %433 = vst.msk [vmem:[%s1102_s1 + $0x68] sm:$0x8] %vm7_vm0, %v137_v43  }
  0x93   :  { %434 = vst.msk [vmem:[%s1102_s1 + $0xc] sm:$0x1] %vm7_vm0, %v149_v44   ;;  %435 = vst.msk [vmem:[%s1102_s1 + $0x2b] sm:$0x2] %vm7_vm0, %v149_v44  }
  0x94   :  { %436 = vst.msk [vmem:[%s1102_s1 + $0x4a] sm:$0x4] %vm7_vm0, %v149_v44   ;;  %437 = vst.msk [vmem:[%s1102_s1 + $0x69] sm:$0x8] %vm7_vm0, %v149_v44   ;;  %v161_v45 = vpop.permute.xlu0 %160  }
  0x95   :  { %v173_v46 = vpop.permute.xlu1 %172   ;;  %438 = vst.msk [vmem:[%s1102_s1 + $0xd] sm:$0x1] %vm7_vm0, %v161_v45   ;;  %439 = vst.msk [vmem:[%s1102_s1 + $0x2c] sm:$0x2] %vm7_vm0, %v161_v45  }
  0x96   :  { %440 = vst.msk [vmem:[%s1102_s1 + $0x4b] sm:$0x4] %vm7_vm0, %v161_v45   ;;  %441 = vst.msk [vmem:[%s1102_s1 + $0x6a] sm:$0x8] %vm7_vm0, %v161_v45  }
  0x97   :  { %442 = vst.msk [vmem:[%s1102_s1 + $0xe] sm:$0x1] %vm7_vm0, %v173_v46   ;;  %443 = vst.msk [vmem:[%s1102_s1 + $0x2d] sm:$0x2] %vm7_vm0, %v173_v46  }
  0x98   :  { %444 = vst.msk [vmem:[%s1102_s1 + $0x4c] sm:$0x4] %vm7_vm0, %v173_v46   ;;  %445 = vst.msk [vmem:[%s1102_s1 + $0x6b] sm:$0x8] %vm7_vm0, %v173_v46   ;;  %v185_v47 = vpop.permute.xlu0 %184  }
  0x99   :  { %v197_v48 = vpop.permute.xlu1 %196   ;;  %446 = vst.msk [vmem:[%s1102_s1 + $0xf] sm:$0x1] %vm7_vm0, %v185_v47   ;;  %447 = vst.msk [vmem:[%s1102_s1 + $0x2e] sm:$0x2] %vm7_vm0, %v185_v47  }
  0x9a   :  { %448 = vst.msk [vmem:[%s1102_s1 + $0x4d] sm:$0x4] %vm7_vm0, %v185_v47   ;;  %449 = vst.msk [vmem:[%s1102_s1 + $0x6c] sm:$0x8] %vm7_vm0, %v185_v47  }
  0x9b   :  { %450 = vst.msk [vmem:[%s1102_s1 + $0x10] sm:$0x1] %vm7_vm0, %v197_v48   ;;  %451 = vst.msk [vmem:[%s1102_s1 + $0x2f] sm:$0x2] %vm7_vm0, %v197_v48  }
  0x9c   :  { %452 = vst.msk [vmem:[%s1102_s1 + $0x4e] sm:$0x4] %vm7_vm0, %v197_v48   ;;  %453 = vst.msk [vmem:[%s1102_s1 + $0x6d] sm:$0x8] %vm7_vm0, %v197_v48   ;;  %v209_v49 = vpop.permute.xlu0 %208  }
  0x9d   :  { %v221_v50 = vpop.permute.xlu1 %220   ;;  %454 = vst.msk [vmem:[%s1102_s1 + $0x11] sm:$0x1] %vm7_vm0, %v209_v49   ;;  %455 = vst.msk [vmem:[%s1102_s1 + $0x30] sm:$0x2] %vm7_vm0, %v209_v49  }
  0x9e   :  { %456 = vst.msk [vmem:[%s1102_s1 + $0x4f] sm:$0x4] %vm7_vm0, %v209_v49   ;;  %457 = vst.msk [vmem:[%s1102_s1 + $0x6e] sm:$0x8] %vm7_vm0, %v209_v49  }
  0x9f   :  { %458 = vst.msk [vmem:[%s1102_s1 + $0x12] sm:$0x1] %vm7_vm0, %v221_v50   ;;  %459 = vst.msk [vmem:[%s1102_s1 + $0x31] sm:$0x2] %vm7_vm0, %v221_v50  }
  0xa0   :  { %460 = vst.msk [vmem:[%s1102_s1 + $0x50] sm:$0x4] %vm7_vm0, %v221_v50   ;;  %461 = vst.msk [vmem:[%s1102_s1 + $0x6f] sm:$0x8] %vm7_vm0, %v221_v50   ;;  %v233_v51 = vpop.permute.xlu0 %232  }
  0xa1   :  { %v245_v52 = vpop.permute.xlu1 %244   ;;  %462 = vst.msk [vmem:[%s1102_s1 + $0x13] sm:$0x1] %vm7_vm0, %v233_v51   ;;  %463 = vst.msk [vmem:[%s1102_s1 + $0x32] sm:$0x2] %vm7_vm0, %v233_v51  }
  0xa2   :  { %464 = vst.msk [vmem:[%s1102_s1 + $0x51] sm:$0x4] %vm7_vm0, %v233_v51   ;;  %465 = vst.msk [vmem:[%s1102_s1 + $0x70] sm:$0x8] %vm7_vm0, %v233_v51  }
  0xa3   :  { %466 = vst.msk [vmem:[%s1102_s1 + $0x14] sm:$0x1] %vm7_vm0, %v245_v52   ;;  %467 = vst.msk [vmem:[%s1102_s1 + $0x33] sm:$0x2] %vm7_vm0, %v245_v52  }
  0xa4   :  { %468 = vst.msk [vmem:[%s1102_s1 + $0x52] sm:$0x4] %vm7_vm0, %v245_v52   ;;  %469 = vst.msk [vmem:[%s1102_s1 + $0x71] sm:$0x8] %vm7_vm0, %v245_v52   ;;  %v257_v53 = vpop.permute.xlu0 %256  }
  0xa5   :  { %v269_v54 = vpop.permute.xlu1 %268   ;;  %470 = vst.msk [vmem:[%s1102_s1 + $0x15] sm:$0x1] %vm7_vm0, %v257_v53   ;;  %471 = vst.msk [vmem:[%s1102_s1 + $0x34] sm:$0x2] %vm7_vm0, %v257_v53  }
  0xa6   :  { %472 = vst.msk [vmem:[%s1102_s1 + $0x53] sm:$0x4] %vm7_vm0, %v257_v53   ;;  %473 = vst.msk [vmem:[%s1102_s1 + $0x72] sm:$0x8] %vm7_vm0, %v257_v53  }
  0xa7   :  { %474 = vst.msk [vmem:[%s1102_s1 + $0x16] sm:$0x1] %vm7_vm0, %v269_v54   ;;  %475 = vst.msk [vmem:[%s1102_s1 + $0x35] sm:$0x2] %vm7_vm0, %v269_v54  }
  0xa8   :  { %476 = vst.msk [vmem:[%s1102_s1 + $0x54] sm:$0x4] %vm7_vm0, %v269_v54   ;;  %477 = vst.msk [vmem:[%s1102_s1 + $0x73] sm:$0x8] %vm7_vm0, %v269_v54   ;;  %v281_v55 = vpop.permute.xlu0 %280  }
  0xa9   :  { %v293_v56 = vpop.permute.xlu1 %292   ;;  %478 = vst.msk [vmem:[%s1102_s1 + $0x17] sm:$0x1] %vm7_vm0, %v281_v55   ;;  %479 = vst.msk [vmem:[%s1102_s1 + $0x36] sm:$0x2] %vm7_vm0, %v281_v55  }
  0xaa   :  { %480 = vst.msk [vmem:[%s1102_s1 + $0x55] sm:$0x4] %vm7_vm0, %v281_v55   ;;  %481 = vst.msk [vmem:[%s1102_s1 + $0x74] sm:$0x8] %vm7_vm0, %v281_v55  }
  0xab   :  { %482 = vst.msk [vmem:[%s1102_s1 + $0x18] sm:$0x1] %vm7_vm0, %v293_v56   ;;  %483 = vst.msk [vmem:[%s1102_s1 + $0x37] sm:$0x2] %vm7_vm0, %v293_v56  }
  0xac   :  { %484 = vst.msk [vmem:[%s1102_s1 + $0x56] sm:$0x4] %vm7_vm0, %v293_v56   ;;  %485 = vst.msk [vmem:[%s1102_s1 + $0x75] sm:$0x8] %vm7_vm0, %v293_v56   ;;  %v305_v57 = vpop.permute.xlu0 %304  }
  0xad   :  { %v317_v58 = vpop.permute.xlu1 %316   ;;  %486 = vst.msk [vmem:[%s1102_s1 + $0x19] sm:$0x1] %vm7_vm0, %v305_v57   ;;  %487 = vst.msk [vmem:[%s1102_s1 + $0x38] sm:$0x2] %vm7_vm0, %v305_v57  }
  0xae   :  { %488 = vst.msk [vmem:[%s1102_s1 + $0x57] sm:$0x4] %vm7_vm0, %v305_v57   ;;  %489 = vst.msk [vmem:[%s1102_s1 + $0x76] sm:$0x8] %vm7_vm0, %v305_v57  }
  0xaf   :  { %490 = vst.msk [vmem:[%s1102_s1 + $0x1a] sm:$0x1] %vm7_vm0, %v317_v58   ;;  %491 = vst.msk [vmem:[%s1102_s1 + $0x39] sm:$0x2] %vm7_vm0, %v317_v58  }
  0xb0   :  { %492 = vst.msk [vmem:[%s1102_s1 + $0x58] sm:$0x4] %vm7_vm0, %v317_v58   ;;  %493 = vst.msk [vmem:[%s1102_s1 + $0x77] sm:$0x8] %vm7_vm0, %v317_v58   ;;  %v329_v59 = vpop.permute.xlu0 %328  }
  0xb1   :  { %v341_v60 = vpop.permute.xlu1 %340   ;;  %494 = vst.msk [vmem:[%s1102_s1 + $0x1b] sm:$0x1] %vm7_vm0, %v329_v59   ;;  %495 = vst.msk [vmem:[%s1102_s1 + $0x3a] sm:$0x2] %vm7_vm0, %v329_v59  }
  0xb2   :  { %496 = vst.msk [vmem:[%s1102_s1 + $0x59] sm:$0x4] %vm7_vm0, %v329_v59   ;;  %497 = vst.msk [vmem:[%s1102_s1 + $0x78] sm:$0x8] %vm7_vm0, %v329_v59  }
  0xb3   :  { %498 = vst.msk [vmem:[%s1102_s1 + $0x1c] sm:$0x1] %vm7_vm0, %v341_v60   ;;  %499 = vst.msk [vmem:[%s1102_s1 + $0x3b] sm:$0x2] %vm7_vm0, %v341_v60  }
  0xb4   :  { %500 = vst.msk [vmem:[%s1102_s1 + $0x5a] sm:$0x4] %vm7_vm0, %v341_v60   ;;  %501 = vst.msk [vmem:[%s1102_s1 + $0x79] sm:$0x8] %vm7_vm0, %v341_v60   ;;  %v353_v61 = vpop.permute.xlu0 %352  }
  0xb5   :  { %v365_v62 = vpop.permute.xlu1 %364   ;;  %502 = vst.msk [vmem:[%s1102_s1 + $0x1d] sm:$0x1] %vm7_vm0, %v353_v61   ;;  %503 = vst.msk [vmem:[%s1102_s1 + $0x3c] sm:$0x2] %vm7_vm0, %v353_v61  }
  0xb6   :  { %504 = vst.msk [vmem:[%s1102_s1 + $0x5b] sm:$0x4] %vm7_vm0, %v353_v61   ;;  %505 = vst.msk [vmem:[%s1102_s1 + $0x7a] sm:$0x8] %vm7_vm0, %v353_v61  }
  0xb7   :  { %506 = vst.msk [vmem:[%s1102_s1 + $0x1e] sm:$0x1] %vm7_vm0, %v365_v62   ;;  %507 = vst.msk [vmem:[%s1102_s1 + $0x3d] sm:$0x2] %vm7_vm0, %v365_v62  }
  0xb8   :  { %508 = vst.msk [vmem:[%s1102_s1 + $0x5c] sm:$0x4] %vm7_vm0, %v365_v62   ;;  %509 = vst.msk [vmem:[%s1102_s1 + $0x7b] sm:$0x8] %vm7_vm0, %v365_v62   ;;  %v377_v63 = vpop.permute.xlu0 %376  }
  0xb9   :  { %510 = vst.msk [vmem:[%s1102_s1 + $0x1f] sm:$0x1] %vm7_vm0, %v377_v63   ;;  %511 = vst.msk [vmem:[%s1102_s1 + $0x3e] sm:$0x2] %vm7_vm0, %v377_v63  }
  0xba   :  { %512 = vst.msk [vmem:[%s1102_s1 + $0x5d] sm:$0x4] %vm7_vm0, %v377_v63   ;;  %513 = vst.msk [vmem:[%s1102_s1 + $0x7c] sm:$0x8] %vm7_vm0, %v377_v63  }

// kernel: cnn_decoder_forward.4
= control target key start
LH: loop header
LB: loop body
LE: loop exit
PB: predicated region body
PF: predicated region fallthrough
CT: control target
= control target key end

     0   :  { %v734_v1 = vmov 0   ;;  %s1059_s1 = inlined_call_operand.vmem [shape: bf16[256,256], index: 1, kind: input, shape index: {}]   ;;  %s1060_s0 = inlined_call_operand.vmem [shape: bf16[128,256], index: 0, kind: input, shape index: {}]   ;;  %s1061_s2 = inlined_call_operand.vmem [shape: f32[128,1], index: 2, kind: input, shape index: {}]   ;;  %s1062_s3 = inlined_call_operand.vmem [shape: f32[128,256], index: 3, kind: output, shape index: {}]  }
   0x1   :  { %v662_v0 = vld [vmem:[%s1059_s1 + $0x4] ss:$8 sps:$4 sm:$0xff]   ;;  %661 = vset.pattern.permute.xlu1 %v734_v1  ;;  %660 = vset.pattern.permute.xlu0 %v734_v1  ;;  %v664_v2 = vld [vmem:[%s1059_s1] ss:$8 sps:$4 sm:$0xff]   ;;  %v665_v3 = vld [vmem:[%s1059_s1 + $0x14] ss:$8 sps:$4 sm:$0xff]  }
   0x2   :  { %398 = vmatprep.subr.bf16.mxu0 %v662_v0  ;;  %627 = vmatprep.subr.bf16.mxu1 %v662_v0  ;;  %v667_v4 = vld [vmem:[%s1059_s1 + $0x10] ss:$8 sps:$4 sm:$0xff]   ;;  %v668_v5 = vld [vmem:[%s1059_s1 + $0x24] ss:$8 sps:$4 sm:$0xff]   ;;  %v670_v6 = vld [vmem:[%s1059_s1 + $0x20] ss:$8 sps:$4 sm:$0xff]  }
   0x3   :  { %399 = vmatpush1.bf16.msra.mxu0 %v664_v2  ;;  %643 = vmatpush1.bf16.msra.mxu1 %v664_v2  ;;  %v671_v7 = vld [vmem:[%s1059_s1 + $0x34] ss:$8 sps:$4 sm:$0xff]   ;;  %v673_v8 = vld [vmem:[%s1059_s1 + $0x30] ss:$8 sps:$4 sm:$0xff]   ;;  %v674_v9 = vld [vmem:[%s1059_s1 + $0x44] ss:$8 sps:$4 sm:$0xff]  }
   0x4   :  { %400 = vmatprep.subr.bf16.mxu0 %v665_v3  ;;  %628 = vmatprep.subr.bf16.mxu1 %v665_v3  ;;  %v676_v10 = vld [vmem:[%s1059_s1 + $0x40] ss:$8 sps:$4 sm:$0xff]   ;;  %v677_v11 = vld [vmem:[%s1059_s1 + $0x54] ss:$8 sps:$4 sm:$0xff]   ;;  %v679_v12 = vld [vmem:[%s1059_s1 + $0x50] ss:$8 sps:$4 sm:$0xff]  }
   0x5   :  { %v680_v13 = vld [vmem:[%s1059_s1 + $0x64] ss:$8 sps:$4 sm:$0xff]   ;;  %v682_v15 = vld [vmem:[%s1059_s1 + $0x60] ss:$8 sps:$4 sm:$0xff]   ;;  %v683_v17 = vld [vmem:[%s1059_s1 + $0x74] ss:$8 sps:$4 sm:$0xff]  }
   0x6   :  { %v712_v14 = vld [vmem:[%s1060_s0 + $0x4] ss:$8 sps:$4 sm:$0xff]   ;;  %v685_v18 = vld [vmem:[%s1059_s1 + $0x70] ss:$8 sps:$4 sm:$0xff]   ;;  %v688_v20 = vld [vmem:[%s1059_s1 + $0x80] ss:$8 sps:$4 sm:$0xff]  }
   0x7   :  { %401 = vmatpush1.bf16.msra.mxu0 %v667_v4  ;;  %644 = vmatpush1.bf16.msra.mxu1 %v667_v4  ;;  %v715_v16 = vld [vmem:[%s1060_s0 + $0x44] ss:$8 sps:$4 sm:$0xff]   ;;  %v689_v21 = vld [vmem:[%s1059_s1 + $0x94] ss:$8 sps:$4 sm:$0xff]   ;;  %v691_v26 = vld [vmem:[%s1059_s1 + $0x90] ss:$8 sps:$4 sm:$0xff]  }
   0x8   :  { %402 = vmatprep.subr.bf16.mxu0 %v668_v5  ;;  %629 = vmatprep.subr.bf16.mxu1 %v668_v5  ;;  %v686_v19 = vld [vmem:[%s1059_s1 + $0x84] ss:$8 sps:$4 sm:$0xff]   ;;  %v64_v22 = vld [vmem:[%s1061_s2 + $0x10] sm:$0xff]  ;;  %v65_v24 = vld [vmem:[%s1061_s2 + $0x18] sm:$0xff] }
   0x9   :  { %430 = vmatprep.mubr.bf16.mxu0 %v712_v14  ;;  %470 = vmatprep.mubr.bf16.mxu1 %v715_v16  ;;  %v62_v23 = vld [vmem:[%s1061_s2] sm:$0xff]  ;;  %v63_v25 = vld [vmem:[%s1061_s2 + $0x8] sm:$0xff]  ;;  %v695_v31 = vld [vmem:[%s1059_s1 + $0xb4] ss:$8 sps:$4 sm:$0xff]  }
   0xa   :  { %90 = vperm.xlu1 %661, %v64_v22   ;;  %80 = vperm.xlu0 %660, %v62_v23   ;;  %v692_v27 = vld [vmem:[%s1059_s1 + $0xa4] ss:$8 sps:$4 sm:$0xff]   ;;  %v694_v30 = vld [vmem:[%s1059_s1 + $0xa0] ss:$8 sps:$4 sm:$0xff]   ;;  %v69_v32 = vld [vmem:[%s1061_s2 + $0x38] sm:$0xff] }
   0xb   :  { %403 = vmatpush1.bf16.msra.mxu0 %v670_v6  ;;  %645 = vmatpush1.bf16.msra.mxu1 %v670_v6  ;;  %v67_v28 = vld [vmem:[%s1061_s2 + $0x28] sm:$0xff]  ;;  %v66_v29 = vld [vmem:[%s1061_s2 + $0x20] sm:$0xff]  ;;  %v68_v33 = vld [vmem:[%s1061_s2 + $0x30] sm:$0xff] }
   0xc   :  { %404 = vmatprep.subr.bf16.mxu0 %v671_v7  ;;  %630 = vmatprep.subr.bf16.mxu1 %v671_v7  ;;  %v697_v34 = vld [vmem:[%s1059_s1 + $0xb0] ss:$8 sps:$4 sm:$0xff]   ;;  %v698_v35 = vld [vmem:[%s1059_s1 + $0xc4] ss:$8 sps:$4 sm:$0xff]   ;;  %v700_v38 = vld [vmem:[%s1059_s1 + $0xc0] ss:$8 sps:$4 sm:$0xff]  }
   0xd   :  { %v71_v36 = vld [vmem:[%s1061_s2 + $0x48] sm:$0xff]  ;;  %v70_v37 = vld [vmem:[%s1061_s2 + $0x40] sm:$0xff]  ;;  %v701_v39 = vld [vmem:[%s1059_s1 + $0xd4] ss:$8 sps:$4 sm:$0xff]  }
   0xe   :  { %95 = vperm.xlu1 %661, %v65_v24   ;;  %85 = vperm.xlu0 %660, %v63_v25   ;;  %v73_v40 = vld [vmem:[%s1061_s2 + $0x58] sm:$0xff]  ;;  %v72_v41 = vld [vmem:[%s1061_s2 + $0x50] sm:$0xff]  ;;  %v704_v43 = vld [vmem:[%s1059_s1 + $0xe4] ss:$8 sps:$4 sm:$0xff]  }
   0xf   :  { %405 = vmatpush1.bf16.msra.mxu0 %v673_v8  ;;  %646 = vmatpush1.bf16.msra.mxu1 %v673_v8  ;;  %v703_v42 = vld [vmem:[%s1059_s1 + $0xd0] ss:$8 sps:$4 sm:$0xff]   ;;  %v75_v44 = vld [vmem:[%s1061_s2 + $0x68] sm:$0xff]  ;;  %v74_v45 = vld [vmem:[%s1061_s2 + $0x60] sm:$0xff] }
  0x10   :  { %406 = vmatprep.subr.bf16.mxu0 %v674_v9  ;;  %631 = vmatprep.subr.bf16.mxu1 %v674_v9  ;;  %v706_v46 = vld [vmem:[%s1059_s1 + $0xe0] ss:$8 sps:$4 sm:$0xff]   ;;  %v707_v47 = vld [vmem:[%s1059_s1 + $0xf4] ss:$8 sps:$4 sm:$0xff]   ;;  %v709_v50 = vld [vmem:[%s1059_s1 + $0xf0] ss:$8 sps:$4 sm:$0xff]  }
  0x11   :  { %v77_v48 = vld [vmem:[%s1061_s2 + $0x78] sm:$0xff]  ;;  %v76_v49 = vld [vmem:[%s1061_s2 + $0x70] sm:$0xff]  ;;  %v710_v51 = vld [vmem:[%s1060_s0] ss:$8 sps:$4 sm:$0xff]  }
  0x12   :  { %105 = vperm.xlu1 %661, %v67_v28   ;;  %100 = vperm.xlu0 %660, %v66_v29   ;;  %v713_v52 = vld [vmem:[%s1060_s0 + $0x40] ss:$8 sps:$4 sm:$0xff]   ;;  %v716_v53 = vld [vmem:[%s1060_s0 + $0x14] ss:$8 sps:$4 sm:$0xff]   ;;  %v720_v55 = vld [vmem:[%s1060_s0 + $0x10] ss:$8 sps:$4 sm:$0xff]  }
  0x13   :  { %407 = vmatpush1.bf16.msra.mxu0 %v676_v10  ;;  %647 = vmatpush1.bf16.msra.mxu1 %v676_v10  ;;  %v718_v54 = vld [vmem:[%s1060_s0 + $0x54] ss:$8 sps:$4 sm:$0xff]   ;;  %v721_v56 = vld [vmem:[%s1060_s0 + $0x50] ss:$8 sps:$4 sm:$0xff]   ;;  %v722_v57 = vld [vmem:[%s1060_s0 + $0x24] ss:$8 sps:$4 sm:$0xff]  }
  0x14   :  { %408 = vmatprep.subr.bf16.mxu0 %v677_v11  ;;  %632 = vmatprep.subr.bf16.mxu1 %v677_v11  ;;  %v724_v58 = vld [vmem:[%s1060_s0 + $0x64] ss:$8 sps:$4 sm:$0xff]   ;;  %v726_v59 = vld [vmem:[%s1060_s0 + $0x20] ss:$8 sps:$4 sm:$0xff]   ;;  %v728_v61 = vld [vmem:[%s1060_s0 + $0x34] ss:$8 sps:$4 sm:$0xff]  }
  0x15   :  { %v727_v60 = vld [vmem:[%s1060_s0 + $0x60] ss:$8 sps:$4 sm:$0xff]   ;;  %v730_v62 = vld [vmem:[%s1060_s0 + $0x74] ss:$8 sps:$4 sm:$0xff]   ;;  %v732_v63 = vld [vmem:[%s1060_s0 + $0x30] ss:$8 sps:$4 sm:$0xff]  }
  0x16   :  { %115 = vperm.xlu1 %661, %v69_v32   ;;  %110 = vperm.xlu0 %660, %v68_v33   ;;  %v733_v0 = vld [vmem:[%s1060_s0 + $0x70] ss:$8 sps:$4 sm:$0xff]  }
  0x17   :  { %409 = vmatpush1.bf16.msra.mxu0 %v679_v12  ;;  %648 = vmatpush1.bf16.msra.mxu1 %v679_v12 }
  0x18   :  { %410 = vmatprep.subr.bf16.mxu0 %v680_v13  ;;  %633 = vmatprep.subr.bf16.mxu1 %v680_v13 }
  0x1a   :  { %125 = vperm.xlu1 %661, %v71_v36   ;;  %120 = vperm.xlu0 %660, %v70_v37  }
  0x1b   :  { %411 = vmatpush1.bf16.msra.mxu0 %v682_v15  ;;  %649 = vmatpush1.bf16.msra.mxu1 %v682_v15 }
  0x1c   :  { %412 = vmatprep.subr.bf16.mxu0 %v683_v17  ;;  %634 = vmatprep.subr.bf16.mxu1 %v683_v17 }
  0x1e   :  { %135 = vperm.xlu1 %661, %v73_v40   ;;  %130 = vperm.xlu0 %660, %v72_v41  }
  0x1f   :  { %413 = vmatpush1.bf16.msra.mxu0 %v685_v18  ;;  %650 = vmatpush1.bf16.msra.mxu1 %v685_v18 }
  0x20   :  { %414 = vmatprep.subr.bf16.mxu0 %v686_v19  ;;  %635 = vmatprep.subr.bf16.mxu1 %v686_v19 }
  0x22   :  { %145 = vperm.xlu1 %661, %v75_v44   ;;  %140 = vperm.xlu0 %660, %v74_v45  }
  0x23   :  { %415 = vmatpush1.bf16.msra.mxu0 %v688_v20  ;;  %651 = vmatpush1.bf16.msra.mxu1 %v688_v20 }
  0x24   :  { %416 = vmatprep.subr.bf16.mxu0 %v689_v21  ;;  %636 = vmatprep.subr.bf16.mxu1 %v689_v21 }
  0x26   :  { %155 = vperm.xlu1 %661, %v77_v48   ;;  %150 = vperm.xlu0 %660, %v76_v49  }
  0x27   :  { %417 = vmatpush1.bf16.msra.mxu0 %v691_v26  ;;  %652 = vmatpush1.bf16.msra.mxu1 %v691_v26 }
  0x28   :  { %418 = vmatprep.subr.bf16.mxu0 %v692_v27  ;;  %637 = vmatprep.subr.bf16.mxu1 %v692_v27 }
  0x2b   :  { %419 = vmatpush1.bf16.msra.mxu0 %v694_v30  ;;  %653 = vmatpush1.bf16.msra.mxu1 %v694_v30 }
  0x2c   :  { %420 = vmatprep.subr.bf16.mxu0 %v695_v31  ;;  %638 = vmatprep.subr.bf16.mxu1 %v695_v31 }
  0x2f   :  { %421 = vmatpush1.bf16.msra.mxu0 %v697_v34  ;;  %654 = vmatpush1.bf16.msra.mxu1 %v697_v34 }
  0x30   :  { %422 = vmatprep.subr.bf16.mxu0 %v698_v35  ;;  %639 = vmatprep.subr.bf16.mxu1 %v698_v35 }
  0x33   :  { %423 = vmatpush1.bf16.msra.mxu0 %v700_v38  ;;  %655 = vmatpush1.bf16.msra.mxu1 %v700_v38 }
  0x34   :  { %424 = vmatprep.subr.bf16.mxu0 %v701_v39  ;;  %640 = vmatprep.subr.bf16.mxu1 %v701_v39 }
  0x37   :  { %425 = vmatpush1.bf16.msra.mxu0 %v703_v42  ;;  %656 = vmatpush1.bf16.msra.mxu1 %v703_v42 }
  0x38   :  { %426 = vmatprep.subr.bf16.mxu0 %v704_v43  ;;  %641 = vmatprep.subr.bf16.mxu1 %v704_v43 }
  0x3b   :  { %427 = vmatpush1.bf16.msra.mxu0 %v706_v46  ;;  %657 = vmatpush1.bf16.msra.mxu1 %v706_v46 }
  0x3c   :  { %428 = vmatprep.subr.bf16.mxu0 %v707_v47  ;;  %642 = vmatprep.subr.bf16.mxu1 %v707_v47 }
  0x3f   :  { %429 = vmatpush1.bf16.msra.mxu0 %v709_v50  ;;  %658 = vmatpush1.bf16.msra.mxu1 %v709_v50 }
  0x42   :  { %431 = vmatmul.mubr.bf16.vlgmr.msra.gmra.mrb[0].mxu0 %v710_v51  ;;  %471 = vmatmul.mubr.bf16.vlgmr.msra.gmra.mrb[0].mxu1 %v713_v52 }
  0x43   :  { %440 = vmatprep.mubr.bf16.mxu0 %v716_v53  ;;  %480 = vmatprep.mubr.bf16.mxu1 %v718_v54 }
  0x4a   :  { %441 = vmatmul.mubr.bf16.gmra.mrb[4].mxu0 %v720_v55  ;;  %481 = vmatmul.mubr.bf16.gmra.mrb[4].mxu1 %v721_v56 }
  0x4b   :  { %450 = vmatprep.mubr.bf16.mxu0 %v722_v57  ;;  %490 = vmatprep.mubr.bf16.mxu1 %v724_v58 }
  0x52   :  { %451 = vmatmul.mubr.bf16.gmra.mrb[8].mxu0 %v726_v59  ;;  %491 = vmatmul.mubr.bf16.gmra.mrb[8].mxu1 %v727_v60 }
  0x53   :  { %460 = vmatprep.mubr.bf16.mxu0 %v728_v61  ;;  %500 = vmatprep.mubr.bf16.mxu1 %v730_v62 }
  0x5a   :  { %461 = vmatmul.mubr.bf16.gmra.mrb[12].mxu0 %v732_v63  ;;  %501 = vmatmul.mubr.bf16.gmra.mrb[12].mxu1 %v733_v0 }
  0x89   :  { %v91_v1 = vpop.permute.xlu1 %90  ;;  %v81_v2 = vpop.permute.xlu0 %80 }
  0x8d   :  { %v96_v3 = vpop.permute.xlu1 %95  ;;  %v86_v4 = vpop.permute.xlu0 %85 }
  0x91   :  { %v947_v5 = vpop.permute.xlu1 %105  ;;  %v949_v6 = vpop.permute.xlu0 %100 }
  0x95   :  { %v951_v7 = vpop.permute.xlu1 %115  ;;  %v953_v8 = vpop.permute.xlu0 %110 }
  0x99   :  { %v126_v9 = vpop.permute.xlu1 %125  ;;  %v121_v10 = vpop.permute.xlu0 %120 }
  0x9d   :  { %v136_v35 = vpop.permute.xlu1 %135  ;;  %v131_v36 = vpop.permute.xlu0 %130 }
  0xa1   :  { %v146_v61 = vpop.permute.xlu1 %145  ;;  %v141_v62 = vpop.permute.xlu0 %140 }
 0x115   :  { %v432_v11 = vpop.f32.mrb[0].mxu0  ;;  %v472_v12 = vpop.f32.mrb[0].mxu1 }
 0x116   :  { %v433_v13 = vadd.f32 %v432_v11, %v81_v2  ;;  %v473_v14 = vadd.f32 %v472_v12, %v121_v10  ;;  %v434_v15 = vpop.f32.mrb[1].mxu0  ;;  %v474_v16 = vpop.f32.mrb[1].mxu1 }
 0x117   :  { %v435_v17 = vadd.f32 %v434_v15, %v81_v2  ;;  %v475_v18 = vadd.f32 %v474_v16, %v121_v10  ;;  %v436_v19 = vpop.f32.mrb[2].mxu0  ;;  %v476_v20 = vpop.f32.mrb[2].mxu1 }
 0x118   :  { %v511_v21 = vmax.f32 %v433_v13, 0.0  ;;  %v527_v22 = vmax.f32 %v473_v14, 0.0  ;;  %v437_v23 = vadd.f32 %v436_v19, %v86_v4  ;;  %v477_v24 = vadd.f32 %v476_v20, %v126_v9  ;;  %v438_v25 = vpop.f32.mrb[3].mxu0  ;;  %v478_v26 = vpop.f32.mrb[3].mxu1 }
 0x119   :  { %v512_v27 = vmax.f32 %v435_v17, 0.0  ;;  %v528_v28 = vmax.f32 %v475_v18, 0.0  ;;  %v439_v29 = vadd.f32 %v438_v25, %v86_v4  ;;  %v479_v30 = vadd.f32 %v478_v26, %v126_v9  ;;  %v156_v25 = vpop.permute.xlu1 %155  ;;  %v151_v26 = vpop.permute.xlu0 %150 }
 0x11a   :  { %543 = vst [vmem:[%s1062_s3] sm:$0xff] %v511_v21  ;;  %559 = vst [vmem:[%s1062_s3 + $0x80] sm:$0xff] %v527_v22  ;;  %v513_v31 = vmax.f32 %v437_v23, 0.0  ;;  %v529_v32 = vmax.f32 %v477_v24, 0.0 }
 0x11b   :  { %544 = vst [vmem:[%s1062_s3 + $0x8] sm:$0xff] %v512_v27  ;;  %560 = vst [vmem:[%s1062_s3 + $0x88] sm:$0xff] %v528_v28  ;;  %v514_v33 = vmax.f32 %v439_v29, 0.0  ;;  %v530_v34 = vmax.f32 %v479_v30, 0.0 }
 0x11c   :  { %545 = vst [vmem:[%s1062_s3 + $0x10] sm:$0xff] %v513_v31  ;;  %561 = vst [vmem:[%s1062_s3 + $0x90] sm:$0xff] %v529_v32 }
 0x11d   :  { %546 = vst [vmem:[%s1062_s3 + $0x18] sm:$0xff] %v514_v33  ;;  %562 = vst [vmem:[%s1062_s3 + $0x98] sm:$0xff] %v530_v34  ;;  %v442_v37 = vpop.f32.mrb[4].mxu0  ;;  %v482_v38 = vpop.f32.mrb[4].mxu1 }
 0x11e   :  { %v443_v39 = vadd.f32 %v442_v37, %v91_v1  ;;  %v483_v40 = vadd.f32 %v482_v38, %v131_v36  ;;  %v444_v41 = vpop.f32.mrb[5].mxu0  ;;  %v484_v42 = vpop.f32.mrb[5].mxu1 }
 0x11f   :  { %v445_v43 = vadd.f32 %v444_v41, %v91_v1  ;;  %v485_v44 = vadd.f32 %v484_v42, %v131_v36  ;;  %v446_v45 = vpop.f32.mrb[6].mxu0  ;;  %v486_v46 = vpop.f32.mrb[6].mxu1 }
 0x120   :  { %v515_v47 = vmax.f32 %v443_v39, 0.0  ;;  %v531_v48 = vmax.f32 %v483_v40, 0.0  ;;  %v447_v49 = vadd.f32 %v446_v45, %v96_v3  ;;  %v487_v50 = vadd.f32 %v486_v46, %v136_v35  ;;  %v448_v51 = vpop.f32.mrb[7].mxu0  ;;  %v488_v52 = vpop.f32.mrb[7].mxu1 }
 0x121   :  { %v516_v53 = vmax.f32 %v445_v43, 0.0  ;;  %v532_v54 = vmax.f32 %v485_v44, 0.0  ;;  %v449_v55 = vadd.f32 %v448_v51, %v96_v3  ;;  %v489_v56 = vadd.f32 %v488_v52, %v136_v35 }
 0x122   :  { %547 = vst [vmem:[%s1062_s3 + $0x20] sm:$0xff] %v515_v47  ;;  %563 = vst [vmem:[%s1062_s3 + $0xa0] sm:$0xff] %v531_v48  ;;  %v517_v57 = vmax.f32 %v447_v49, 0.0  ;;  %v533_v58 = vmax.f32 %v487_v50, 0.0 }
 0x123   :  { %548 = vst [vmem:[%s1062_s3 + $0x28] sm:$0xff] %v516_v53  ;;  %564 = vst [vmem:[%s1062_s3 + $0xa8] sm:$0xff] %v532_v54  ;;  %v518_v59 = vmax.f32 %v449_v55, 0.0  ;;  %v534_v60 = vmax.f32 %v489_v56, 0.0 }
 0x124   :  { %549 = vst [vmem:[%s1062_s3 + $0x30] sm:$0xff] %v517_v57  ;;  %565 = vst [vmem:[%s1062_s3 + $0xb0] sm:$0xff] %v533_v58 }
 0x125   :  { %550 = vst [vmem:[%s1062_s3 + $0x38] sm:$0xff] %v518_v59  ;;  %566 = vst [vmem:[%s1062_s3 + $0xb8] sm:$0xff] %v534_v60  ;;  %v452_v63 = vpop.f32.mrb[8].mxu0  ;;  %v492_v0 = vpop.f32.mrb[8].mxu1 }
 0x126   :  { %v453_v1 = vadd.f32 %v452_v63, %v949_v6  ;;  %v493_v2 = vadd.f32 %v492_v0, %v141_v62  ;;  %v454_v3 = vpop.f32.mrb[9].mxu0  ;;  %v494_v4 = vpop.f32.mrb[9].mxu1 }
 0x127   :  { %v455_v9 = vadd.f32 %v454_v3, %v949_v6  ;;  %v495_v10 = vadd.f32 %v494_v4, %v141_v62  ;;  %v456_v11 = vpop.f32.mrb[10].mxu0  ;;  %v496_v12 = vpop.f32.mrb[10].mxu1 }
 0x128   :  { %v519_v13 = vmax.f32 %v453_v1, 0.0  ;;  %v535_v14 = vmax.f32 %v493_v2, 0.0  ;;  %v457_v15 = vadd.f32 %v456_v11, %v947_v5  ;;  %v497_v16 = vadd.f32 %v496_v12, %v146_v61  ;;  %v458_v17 = vpop.f32.mrb[11].mxu0  ;;  %v498_v18 = vpop.f32.mrb[11].mxu1 }
 0x129   :  { %v520_v19 = vmax.f32 %v455_v9, 0.0  ;;  %v536_v20 = vmax.f32 %v495_v10, 0.0  ;;  %v459_v21 = vadd.f32 %v458_v17, %v947_v5  ;;  %v499_v22 = vadd.f32 %v498_v18, %v146_v61 }
 0x12a   :  { %551 = vst [vmem:[%s1062_s3 + $0x40] sm:$0xff] %v519_v13  ;;  %567 = vst [vmem:[%s1062_s3 + $0xc0] sm:$0xff] %v535_v14  ;;  %v521_v6 = vmax.f32 %v457_v15, 0.0  ;;  %v537_v23 = vmax.f32 %v497_v16, 0.0 }
 0x12b   :  { %552 = vst [vmem:[%s1062_s3 + $0x48] sm:$0xff] %v520_v19  ;;  %568 = vst [vmem:[%s1062_s3 + $0xc8] sm:$0xff] %v536_v20  ;;  %v522_v5 = vmax.f32 %v459_v21, 0.0  ;;  %v538_v24 = vmax.f32 %v499_v22, 0.0 }
 0x12c   :  { %553 = vst [vmem:[%s1062_s3 + $0x50] sm:$0xff] %v521_v6  ;;  %569 = vst [vmem:[%s1062_s3 + $0xd0] sm:$0xff] %v537_v23 }
 0x12d   :  { %554 = vst [vmem:[%s1062_s3 + $0x58] sm:$0xff] %v522_v5  ;;  %570 = vst [vmem:[%s1062_s3 + $0xd8] sm:$0xff] %v538_v24  ;;  %v462_v27 = vpop.f32.mrb[12].mxu0  ;;  %v502_v28 = vpop.f32.mrb[12].mxu1 }
 0x12e   :  { %v463_v29 = vadd.f32 %v462_v27, %v953_v8  ;;  %v503_v30 = vadd.f32 %v502_v28, %v151_v26  ;;  %v464_v31 = vpop.f32.mrb[13].mxu0  ;;  %v504_v32 = vpop.f32.mrb[13].mxu1 }
 0x12f   :  { %v465_v33 = vadd.f32 %v464_v31, %v953_v8  ;;  %v505_v34 = vadd.f32 %v504_v32, %v151_v26  ;;  %v466_v35 = vpop.f32.mrb[14].mxu0  ;;  %v506_v36 = vpop.f32.mrb[14].mxu1 }
 0x130   :  { %v523_v37 = vmax.f32 %v463_v29, 0.0  ;;  %v539_v38 = vmax.f32 %v503_v30, 0.0  ;;  %v467_v39 = vadd.f32 %v466_v35, %v951_v7  ;;  %v507_v40 = vadd.f32 %v506_v36, %v156_v25  ;;  %v468_v41 = vpop.f32.mrb[15].mxu0  ;;  %v508_v42 = vpop.f32.mrb[15].mxu1 }
 0x131   :  { %v524_v43 = vmax.f32 %v465_v33, 0.0  ;;  %v540_v44 = vmax.f32 %v505_v34, 0.0  ;;  %v469_v45 = vadd.f32 %v468_v41, %v951_v7  ;;  %v509_v46 = vadd.f32 %v508_v42, %v156_v25 }
 0x132   :  { %555 = vst [vmem:[%s1062_s3 + $0x60] sm:$0xff] %v523_v37  ;;  %571 = vst [vmem:[%s1062_s3 + $0xe0] sm:$0xff] %v539_v38  ;;  %v525_v8 = vmax.f32 %v467_v39, 0.0  ;;  %v541_v47 = vmax.f32 %v507_v40, 0.0 }
 0x133   :  { %556 = vst [vmem:[%s1062_s3 + $0x68] sm:$0xff] %v524_v43  ;;  %572 = vst [vmem:[%s1062_s3 + $0xe8] sm:$0xff] %v540_v44  ;;  %v526_v7 = vmax.f32 %v469_v45, 0.0  ;;  %v542_v48 = vmax.f32 %v509_v46, 0.0 }
 0x134   :  { %557 = vst [vmem:[%s1062_s3 + $0x70] sm:$0xff] %v525_v8  ;;  %573 = vst [vmem:[%s1062_s3 + $0xf0] sm:$0xff] %v541_v47 }
 0x135   :  { %558 = vst [vmem:[%s1062_s3 + $0x78] sm:$0xff] %v526_v7  ;;  %574 = vst [vmem:[%s1062_s3 + $0xf8] sm:$0xff] %v542_v48 }

// kernel: tile.20
= control target key start
LH: loop header
LB: loop body
LE: loop exit
PB: predicated region body
PF: predicated region fallthrough
CT: control target
= control target key end

     0   :  { %s28_s0 = inlined_call_operand.vmem [shape: f32[4], index: 0, kind: input, shape index: {}]   ;;  %s29_s1 = inlined_call_operand.vmem [shape: f32[16,4], index: 1, kind: output, shape index: {}]  }
   0x1   :  { %v4_v0 = vld [vmem:[%s28_s0] ss:$0 sm:$0xff] }
   0x2   :  { %5 = vst [vmem:[%s29_s1] sm:$0xff] %v4_v0  ;;  %8 = vst [vmem:[%s29_s1 + $0x8] sm:$0xff] %v4_v0 }

// kernel: tile.1
= control target key start
LH: loop header
LB: loop body
LE: loop exit
PB: predicated region body
PF: predicated region fallthrough
CT: control target
= control target key end

     0   :  { %vm3_vm0 = vcmask 7168   ;;  %s64_s10 = smov 127   ;;  %s65_s15 = smov 125   ;;  %s114_s0 = inlined_call_operand.vmem [shape: f32[16,4], index: 0, kind: input, shape index: {}]   ;;  %s115_s1 = inlined_call_operand.vmem [shape: f32[64,1], index: 1, kind: output, shape index: {}]  }
   0x1   :  { %v23_v0 = vld [vmem:[%s114_s0] sm:$0xff]   ;;  %v49_v1 = vld [vmem:[%s114_s0 + $0x8] sm:$0xff]   ;;  %s63_s0 = smov 126  }
   0x2   :  { %24 = vrot.lane.b32.xlu1 %v23_v0, %s63_s0  ;;  %11 = vrot.lane.b32.xlu0 %v23_v0, %s64_s10  ;;  %4 = vst.msk [vmem:[%s115_s1] ss:$4 sm:$0xff] %vm3_vm0, %v23_v0   ;;  %50 = vst.msk [vmem:[%s115_s1 + $0x20] ss:$4 sm:$0xff] %vm3_vm0, %v49_v1  }
   0x6   :  { %31 = vrot.lane.b32.xlu1 %v49_v1, %s63_s0  ;;  %18 = vrot.lane.b32.xlu0 %v49_v1, %s64_s10 }
   0xa   :  { %44 = vrot.lane.b32.xlu1 %v49_v1, %s65_s15  ;;  %37 = vrot.lane.b32.xlu0 %v23_v0, %s65_s15 }
  0x74   :  { %v25_v2 = vpop.permute.xlu1 %24   ;;  %v12_v3 = vpop.permute.xlu0 %11  }
  0x75   :  { %54 = vst.msk [vmem:[%s115_s1 + $0x2] ss:$4 sm:$0xff] %vm3_vm0, %v25_v2   ;;  %51 = vst.msk [vmem:[%s115_s1 + $0x1] ss:$4 sm:$0xff] %vm3_vm0, %v12_v3  }
  0x78   :  { %v32_v4 = vpop.permute.xlu1 %31   ;;  %v19_v5 = vpop.permute.xlu0 %18  }
  0x79   :  { %56 = vst.msk [vmem:[%s115_s1 + $0x22] ss:$4 sm:$0xff] %vm3_vm0, %v32_v4   ;;  %53 = vst.msk [vmem:[%s115_s1 + $0x21] ss:$4 sm:$0xff] %vm3_vm0, %v19_v5  }
  0x7c   :  { %v45_v6 = vpop.permute.xlu1 %44   ;;  %v38_v7 = vpop.permute.xlu0 %37  }
  0x7d   :  { %59 = vst.msk [vmem:[%s115_s1 + $0x23] ss:$4 sm:$0xff] %vm3_vm0, %v45_v6   ;;  %57 = vst.msk [vmem:[%s115_s1 + $0x3] ss:$4 sm:$0xff] %vm3_vm0, %v38_v7  }

// kernel: cnn_decoder_forward.5
= control target key start
LH: loop header
LB: loop body
LE: loop exit
PB: predicated region body
PF: predicated region fallthrough
CT: control target
= control target key end

     0   :  { %s1342_s12 = smov 0   ;;  %s1344_s13 = smov 0   ;;  %s1687_s0 = inlined_call_operand.vmem [shape: bf16[64,128], index: 0, kind: input, shape index: {}]   ;;  %s1688_s1 = inlined_call_operand.vmem [shape: bf16[128,1024], index: 1, kind: input, shape index: {}]   ;;  %s1689_s2 = inlined_call_operand.vmem [shape: f32[64,1], index: 2, kind: input, shape index: {}]   ;;  %s1690_s3 = inlined_call_operand.vmem [shape: f32[64,1024], index: 3, kind: output, shape index: {}]  }
   0x1   :  { %s1346_s14 = smov 0  }
   0x2 LB: > { %s1037_s15 = sadd.s32 4294967295, %s1319_s14   ;;  %s1359_s16 = sadd.s32 1, %s1319_s14   ;;  %s1319_s14 = sphi %s1346_s14, %s1694_s14   ;;  %s1315_s13 = sphi %s1344_s13, %s1693_s13   ;;  %s1311_s12 = sphi %s1342_s12, %s1692_s12  }
   0x3   : > { %s38_s17 = ssub.s32 %s1319_s14, %s1359_s16  ;;  %s41_s18 = sadd.s32 1, %s1315_s13 }
   0x4   : > { %p39_p0 = scmp.eq.s32.totalorder %s38_s17, 0  ;;  %p48_p1 = scmp.ne.s32.totalorder %s1315_s13, %s1311_s12 }
   0x5   : > { %p49_p2 = scmp.eq.s32.totalorder %s1319_s14, 0  ;;  %p99_p3 = scmp.eq.s32.totalorder %s1037_s15, 1 }
   0x6   : > { %s1370_s19 = scalar_select %p39_p0, %s1315_s13, %s41_s18  }
   0x7   : > { %p50_p4 = por %p49_p2, %p48_p1  ;;  %p1372_p5 = por %p99_p3, %p48_p1 }
   0x8   : > { %p1040_p6 = scmp.ge.s32.totalorder %s1319_s14, 2 }
   0xa   : > { %127 = sbr.rel (%p1040_p6) target bundleno = 37 (0x25), region = 24 }
  0x11   : > { %130 = sbr.rel (!%p50_p4) target bundleno = 37 (0x25), region = 28  ;;  %s132_s21 = sand.u32 (%p50_p4), 1, %s1315_s13  }
  0x12   : > { %s1088_s22 = sshll.u32 (%p50_p4), %s1319_s14, 4  ;;  %s1041_s23 = sshll.u32 (%p50_p4), %s132_s21, 8 }
  0x13   : > { %s1382_s26 = scalar_lea.vmem (%p50_p4), %s1688_s1, %s1088_s22  ;;  %s1387_s27 = scalar_lea.vmem (%p50_p4), [#allocation2], %s1041_s23 }
  0x14   : > { %v150_v0 = vld [vmem:[%s1382_s26] sm:$0xff] (%p50_p4)  ;;  %v152_v1 = vld [vmem:[%s1382_s26 + $0x8] sm:$0xff] (%p50_p4) }
  0x15   : > { %v154_v2 = vld [vmem:[%s1382_s26 + $0x20] sm:$0xff] (%p50_p4)  ;;  %151 = vst [vmem:[%s1387_s27] sm:$0xff] (%p50_p4), %v150_v0  ;;  %153 = vst [vmem:[%s1387_s27 + $0x8] sm:$0xff] (%p50_p4), %v152_v1  ;;  %v156_v3 = vld [vmem:[%s1382_s26 + $0x28] sm:$0xff] (%p50_p4) }
  0x16   : > { %155 = vst [vmem:[%s1387_s27 + $0x10] sm:$0xff] (%p50_p4), %v154_v2  ;;  %v158_v4 = vld [vmem:[%s1382_s26 + $0x40] sm:$0xff] (%p50_p4)  ;;  %v160_v5 = vld [vmem:[%s1382_s26 + $0x48] sm:$0xff] (%p50_p4)  ;;  %157 = vst [vmem:[%s1387_s27 + $0x18] sm:$0xff] (%p50_p4), %v156_v3 }
  0x17   : > { %159 = vst [vmem:[%s1387_s27 + $0x20] sm:$0xff] (%p50_p4), %v158_v4  ;;  %161 = vst [vmem:[%s1387_s27 + $0x28] sm:$0xff] (%p50_p4), %v160_v5  ;;  %v162_v6 = vld [vmem:[%s1382_s26 + $0x60] sm:$0xff] (%p50_p4)  ;;  %v164_v7 = vld [vmem:[%s1382_s26 + $0x68] sm:$0xff] (%p50_p4) }
  0x18   : > { %v166_v8 = vld [vmem:[%s1382_s26 + $0x80] sm:$0xff]  ;;  %163 = vst [vmem:[%s1387_s27 + $0x30] sm:$0xff] %v162_v6  ;;  %165 = vst [vmem:[%s1387_s27 + $0x38] sm:$0xff] %v164_v7  ;;  %v168_v9 = vld [vmem:[%s1382_s26 + $0x88] sm:$0xff] }
  0x19   : > { %167 = vst [vmem:[%s1387_s27 + $0x40] sm:$0xff] %v166_v8  ;;  %v170_v10 = vld [vmem:[%s1382_s26 + $0xa0] sm:$0xff]  ;;  %v172_v11 = vld [vmem:[%s1382_s26 + $0xa8] sm:$0xff]  ;;  %169 = vst [vmem:[%s1387_s27 + $0x48] sm:$0xff] %v168_v9 }
  0x1a   : > { %171 = vst [vmem:[%s1387_s27 + $0x50] sm:$0xff] %v170_v10  ;;  %173 = vst [vmem:[%s1387_s27 + $0x58] sm:$0xff] %v172_v11  ;;  %v174_v12 = vld [vmem:[%s1382_s26 + $0xc0] sm:$0xff]  ;;  %v176_v13 = vld [vmem:[%s1382_s26 + $0xc8] sm:$0xff] }
  0x1b   : > { %v178_v14 = vld [vmem:[%s1382_s26 + $0xe0] sm:$0xff]  ;;  %175 = vst [vmem:[%s1387_s27 + $0x60] sm:$0xff] %v174_v12  ;;  %177 = vst [vmem:[%s1387_s27 + $0x68] sm:$0xff] %v176_v13  ;;  %v180_v15 = vld [vmem:[%s1382_s26 + $0xe8] sm:$0xff] }
  0x1c   : > { %179 = vst [vmem:[%s1387_s27 + $0x70] sm:$0xff] %v178_v14  ;;  %v182_v16 = vld [vmem:[%s1382_s26 + $0x100] sm:$0xff]  ;;  %v184_v17 = vld [vmem:[%s1382_s26 + $0x108] sm:$0xff]  ;;  %181 = vst [vmem:[%s1387_s27 + $0x78] sm:$0xff] %v180_v15 }
  0x1d   : > { %183 = vst [vmem:[%s1387_s27 + $0x80] sm:$0xff] %v182_v16  ;;  %185 = vst [vmem:[%s1387_s27 + $0x88] sm:$0xff] %v184_v17  ;;  %v186_v18 = vld [vmem:[%s1382_s26 + $0x120] sm:$0xff]  ;;  %v188_v19 = vld [vmem:[%s1382_s26 + $0x128] sm:$0xff] }
  0x1e   : > { %v190_v20 = vld [vmem:[%s1382_s26 + $0x140] sm:$0xff]  ;;  %187 = vst [vmem:[%s1387_s27 + $0x90] sm:$0xff] %v186_v18  ;;  %189 = vst [vmem:[%s1387_s27 + $0x98] sm:$0xff] %v188_v19  ;;  %v192_v21 = vld [vmem:[%s1382_s26 + $0x148] sm:$0xff] }
  0x1f   : > { %191 = vst [vmem:[%s1387_s27 + $0xa0] sm:$0xff] %v190_v20  ;;  %v194_v22 = vld [vmem:[%s1382_s26 + $0x160] sm:$0xff]  ;;  %v196_v23 = vld [vmem:[%s1382_s26 + $0x168] sm:$0xff]  ;;  %193 = vst [vmem:[%s1387_s27 + $0xa8] sm:$0xff] %v192_v21 }
  0x20   : > { %195 = vst [vmem:[%s1387_s27 + $0xb0] sm:$0xff] %v194_v22  ;;  %197 = vst [vmem:[%s1387_s27 + $0xb8] sm:$0xff] %v196_v23  ;;  %v198_v24 = vld [vmem:[%s1382_s26 + $0x180] sm:$0xff]  ;;  %v200_v25 = vld [vmem:[%s1382_s26 + $0x188] sm:$0xff] }
  0x21   : > { %v202_v26 = vld [vmem:[%s1382_s26 + $0x1a0] sm:$0xff]  ;;  %199 = vst [vmem:[%s1387_s27 + $0xc0] sm:$0xff] %v198_v24  ;;  %201 = vst [vmem:[%s1387_s27 + $0xc8] sm:$0xff] %v200_v25  ;;  %v204_v27 = vld [vmem:[%s1382_s26 + $0x1a8] sm:$0xff] }
  0x22   : > { %203 = vst [vmem:[%s1387_s27 + $0xd0] sm:$0xff] %v202_v26  ;;  %v206_v28 = vld [vmem:[%s1382_s26 + $0x1c0] sm:$0xff]  ;;  %v208_v29 = vld [vmem:[%s1382_s26 + $0x1c8] sm:$0xff]  ;;  %205 = vst [vmem:[%s1387_s27 + $0xd8] sm:$0xff] %v204_v27 }
  0x23   : > { %207 = vst [vmem:[%s1387_s27 + $0xe0] sm:$0xff] %v206_v28  ;;  %209 = vst [vmem:[%s1387_s27 + $0xe8] sm:$0xff] %v208_v29  ;;  %v210_v30 = vld [vmem:[%s1382_s26 + $0x1e0] sm:$0xff]  ;;  %v212_v31 = vld [vmem:[%s1382_s26 + $0x1e8] sm:$0xff] }
  0x24   : > { %211 = vst [vmem:[%s1387_s27 + $0xf0] sm:$0xff] %v210_v30  ;;  %213 = vst [vmem:[%s1387_s27 + $0xf8] sm:$0xff] %v212_v31 }
  0x25 PF: > { %p1044_p7 = scmp.ge.s32.totalorder %s1319_s14, 1  ;;  %p218_p8 = scmp.lt.s32.totalorder %s1319_s14, 3 }
  0x27   : > { %p219_p9 = pnand %p1044_p7, %p218_p8 }
  0x28   : > { %s225_s28 = sand.u32 (!%p219_p9), 1, %s1311_s12   ;;  %v1321_v32 = vmov (!%p219_p9), 0   ;;  %v290_v59 = vld [vmem:[%s1689_s2] sm:$0xff] (!%p219_p9)  ;;  %v292_v60 = vld [vmem:[%s1689_s2 + $0x10] sm:$0xff] (!%p219_p9)  ;;  %v291_v63 = vld [vmem:[%s1689_s2 + $0x8] sm:$0xff] (!%p219_p9) }
  0x29   : > { %222 = sbr.rel (%p219_p9) target bundleno = 386 (0x182), region = 51  ;;  %s1453_s29 = sshll.u32 (!%p219_p9), %s225_s28, 8  ;;  %554 = vmatprep.mubr.bf16.mxu0 (!%p219_p9), %v1321_v32  ;;  %627 = vmatprep.mubr.bf16.mxu1 (!%p219_p9), %v1321_v32  ;;  %v293_v2 = vld [vmem:[%s1689_s2 + $0x18] sm:$0xff] (!%p219_p9)  ;;  %v294_v5 = vld [vmem:[%s1689_s2 + $0x20] sm:$0xff] (!%p219_p9)  ;;  %v295_v7 = vld [vmem:[%s1689_s2 + $0x28] sm:$0xff] (!%p219_p9) }
  0x2a   : > { %1115 = vset.pattern.permute.xlu0 (!%p219_p9), %v1321_v32  ;;  %1116 = vset.pattern.permute.xlu1 (!%p219_p9), %v1321_v32  ;;  %s1460_s30 = scalar_lea.vmem (!%p219_p9), [#allocation2], %s1453_s29  ;;  %v1165_v6 = vld [vmem:[%s1687_s0] sm:$0xff] (!%p219_p9)   ;;  %v296_v8 = vld [vmem:[%s1689_s2 + $0x30] sm:$0xff] (!%p219_p9)  ;;  %v297_v9 = vld [vmem:[%s1689_s2 + $0x38] sm:$0xff] (!%p219_p9)  ;;  %s1557_s8 = scalar_lea.vmem (!%p219_p9), [#allocation3], %s1453_s29 }
  0x2b   : > { %v1117_v33 = vld [vmem:[%s1460_s30 + $0x4] ss:$16 sps:$4 sm:$0xff] (!%p219_p9)   ;;  %v1119_v34 = vld [vmem:[%s1460_s30 + $0xc] ss:$16 sps:$4 sm:$0xff] (!%p219_p9)   ;;  %v1121_v35 = vld [vmem:[%s1460_s30] ss:$16 sps:$4 sm:$0xff] (!%p219_p9)   ;;  %300 = vperm.xlu0 (!%p219_p9), %1115, %v290_v59   ;;  %310 = vperm.xlu1 (!%p219_p9), %1116, %v292_v60  }
  0x2c   : > { %522 = vmatprep.subr.bf16.mxu0 (!%p219_p9), %v1117_v33  ;;  %v1122_v36 = vld [vmem:[%s1460_s30 + $0x8] ss:$16 sps:$4 sm:$0xff] (!%p219_p9)   ;;  %595 = vmatprep.subr.bf16.mxu1 (!%p219_p9), %v1119_v34  ;;  %v1123_v37 = vld [vmem:[%s1460_s30 + $0x24] ss:$16 sps:$4 sm:$0xff] (!%p219_p9)   ;;  %v1125_v38 = vld [vmem:[%s1460_s30 + $0x2c] ss:$16 sps:$4 sm:$0xff] (!%p219_p9)  }
  0x2d   : > { %523 = vmatpush1.bf16.msra.mxu0 (!%p219_p9), %v1121_v35  ;;  %596 = vmatpush1.bf16.msra.mxu1 (!%p219_p9), %v1122_v36  ;;  %v1127_v39 = vld [vmem:[%s1460_s30 + $0x20] ss:$16 sps:$4 sm:$0xff] (!%p219_p9)   ;;  %v1128_v40 = vld [vmem:[%s1460_s30 + $0x28] ss:$16 sps:$4 sm:$0xff] (!%p219_p9)   ;;  %v1129_v41 = vld [vmem:[%s1460_s30 + $0x44] ss:$16 sps:$4 sm:$0xff] (!%p219_p9)  }
  0x2e   : > { %524 = vmatprep.subr.bf16.mxu0 (!%p219_p9), %v1123_v37  ;;  %597 = vmatprep.subr.bf16.mxu1 (!%p219_p9), %v1125_v38  ;;  %v1131_v42 = vld [vmem:[%s1460_s30 + $0x4c] ss:$16 sps:$4 sm:$0xff] (!%p219_p9)   ;;  %v1133_v43 = vld [vmem:[%s1460_s30 + $0x40] ss:$16 sps:$4 sm:$0xff] (!%p219_p9)   ;;  %v1134_v44 = vld [vmem:[%s1460_s30 + $0x48] ss:$16 sps:$4 sm:$0xff] (!%p219_p9)  }
  0x2f   : > { %v1135_v45 = vld [vmem:[%s1460_s30 + $0x64] ss:$16 sps:$4 sm:$0xff] (!%p219_p9)   ;;  %v1137_v46 = vld [vmem:[%s1460_s30 + $0x6c] ss:$16 sps:$4 sm:$0xff] (!%p219_p9)   ;;  %v1139_v47 = vld [vmem:[%s1460_s30 + $0x60] ss:$16 sps:$4 sm:$0xff] (!%p219_p9)   ;;  %305 = vperm.xlu0 (!%p219_p9), %1115, %v291_v63   ;;  %315 = vperm.xlu1 (!%p219_p9), %1116, %v293_v2  }
  0x30   : > { %v1140_v48 = vld [vmem:[%s1460_s30 + $0x68] ss:$16 sps:$4 sm:$0xff]   ;;  %v1141_v49 = vld [vmem:[%s1460_s30 + $0x84] ss:$16 sps:$4 sm:$0xff]   ;;  %v1143_v50 = vld [vmem:[%s1460_s30 + $0x8c] ss:$16 sps:$4 sm:$0xff]  }
  0x31   : > { %525 = vmatpush1.bf16.msra.mxu0 %v1127_v39  ;;  %598 = vmatpush1.bf16.msra.mxu1 %v1128_v40  ;;  %v1145_v51 = vld [vmem:[%s1460_s30 + $0x80] ss:$16 sps:$4 sm:$0xff]   ;;  %v1146_v52 = vld [vmem:[%s1460_s30 + $0x88] ss:$16 sps:$4 sm:$0xff]   ;;  %v1147_v53 = vld [vmem:[%s1460_s30 + $0xa4] ss:$16 sps:$4 sm:$0xff]  }
  0x32   : > { %526 = vmatprep.subr.bf16.mxu0 %v1129_v41  ;;  %599 = vmatprep.subr.bf16.mxu1 %v1131_v42  ;;  %v1149_v54 = vld [vmem:[%s1460_s30 + $0xac] ss:$16 sps:$4 sm:$0xff]   ;;  %v1151_v55 = vld [vmem:[%s1460_s30 + $0xa0] ss:$16 sps:$4 sm:$0xff]   ;;  %v1152_v56 = vld [vmem:[%s1460_s30 + $0xa8] ss:$16 sps:$4 sm:$0xff]  }
  0x33   : > { %v1153_v57 = vld [vmem:[%s1460_s30 + $0xc4] ss:$16 sps:$4 sm:$0xff]   ;;  %v1155_v58 = vld [vmem:[%s1460_s30 + $0xcc] ss:$16 sps:$4 sm:$0xff]   ;;  %v1157_v61 = vld [vmem:[%s1460_s30 + $0xc0] ss:$16 sps:$4 sm:$0xff]   ;;  %320 = vperm.xlu0 %1115, %v294_v5   ;;  %325 = vperm.xlu1 %1116, %v295_v7  }
  0x34   : > { %v1158_v62 = vld [vmem:[%s1460_s30 + $0xc8] ss:$16 sps:$4 sm:$0xff]   ;;  %v1159_v0 = vld [vmem:[%s1460_s30 + $0xe4] ss:$16 sps:$4 sm:$0xff]   ;;  %v1161_v1 = vld [vmem:[%s1460_s30 + $0xec] ss:$16 sps:$4 sm:$0xff]  }
  0x35   : > { %527 = vmatpush1.bf16.msra.mxu0 %v1133_v43  ;;  %600 = vmatpush1.bf16.msra.mxu1 %v1134_v44  ;;  %v1163_v3 = vld [vmem:[%s1460_s30 + $0xe0] ss:$16 sps:$4 sm:$0xff]   ;;  %v1164_v4 = vld [vmem:[%s1460_s30 + $0xe8] ss:$16 sps:$4 sm:$0xff]   ;;  %s1089_s29 = sshll.u32 (%p1372_p5), %s1037_s15, 5 }
  0x36   : > { %528 = vmatprep.subr.bf16.mxu0 %v1135_v45  ;;  %601 = vmatprep.subr.bf16.mxu1 %v1137_v46  ;;  %v1166_v10 = vld [vmem:[%s1687_s0 + $0x8] sm:$0xff]   ;;  %v1167_v11 = vld [vmem:[%s1687_s0 + $0x10] sm:$0xff]   ;;  %v1168_v12 = vld [vmem:[%s1687_s0 + $0x18] sm:$0xff]   ;;  %s1614_s20 = scalar_lea.vmem (%p1372_p5), %s1690_s3, %s1089_s29 }
  0x37   : > { %330 = vperm.xlu0 %1115, %v296_v8   ;;  %335 = vperm.xlu1 %1116, %v297_v9  }
  0x39   : > { %529 = vmatpush1.bf16.msra.mxu0 %v1139_v47  ;;  %602 = vmatpush1.bf16.msra.mxu1 %v1140_v48 }
  0x3a   : > { %530 = vmatprep.subr.bf16.mxu0 %v1141_v49  ;;  %603 = vmatprep.subr.bf16.mxu1 %v1143_v50 }
  0x3d   : > { %531 = vmatpush1.bf16.msra.mxu0 %v1145_v51  ;;  %604 = vmatpush1.bf16.msra.mxu1 %v1146_v52 }
  0x3e   : > { %532 = vmatprep.subr.bf16.mxu0 %v1147_v53  ;;  %605 = vmatprep.subr.bf16.mxu1 %v1149_v54 }
  0x41   : > { %533 = vmatpush1.bf16.msra.mxu0 %v1151_v55  ;;  %606 = vmatpush1.bf16.msra.mxu1 %v1152_v56 }
  0x42   : > { %534 = vmatprep.subr.bf16.mxu0 %v1153_v57  ;;  %607 = vmatprep.subr.bf16.mxu1 %v1155_v58 }
  0x45   : > { %535 = vmatpush1.bf16.msra.mxu0 %v1157_v61  ;;  %608 = vmatpush1.bf16.msra.mxu1 %v1158_v62 }
  0x46   : > { %536 = vmatprep.subr.bf16.mxu0 %v1159_v0  ;;  %609 = vmatprep.subr.bf16.mxu1 %v1161_v1 }
  0x49   : > { %537 = vmatpush1.bf16.msra.mxu0 %v1163_v3  ;;  %610 = vmatpush1.bf16.msra.mxu1 %v1164_v4 }
  0x4c   : > { %555 = vmatmul.mubr.bf16.vlgmr.msra.gmra.mrb[0].mxu0 %v1165_v6  ;;  %628 = vmatmul.mubr.bf16.vlgmr.msra.gmra.mrb[0].mxu1 %v1165_v6 }
  0x4d   : > { %564 = vmatprep.mubr.bf16.mxu0 %v1321_v32  ;;  %637 = vmatprep.mubr.bf16.mxu1 %v1321_v32 }
  0x54   : > { %565 = vmatmul.mubr.bf16.gmra.mrb[4].mxu0 %v1166_v10  ;;  %638 = vmatmul.mubr.bf16.gmra.mrb[4].mxu1 %v1166_v10 }
  0x55   : > { %574 = vmatprep.mubr.bf16.mxu0 %v1321_v32  ;;  %647 = vmatprep.mubr.bf16.mxu1 %v1321_v32 }
  0x5c   : > { %575 = vmatmul.mubr.bf16.gmra.mrb[8].mxu0 %v1167_v11  ;;  %648 = vmatmul.mubr.bf16.gmra.mrb[8].mxu1 %v1167_v11 }
  0x5d   : > { %584 = vmatprep.mubr.bf16.mxu0 %v1321_v32  ;;  %657 = vmatprep.mubr.bf16.mxu1 %v1321_v32 }
  0x64   : > { %585 = vmatmul.mubr.bf16.gmra.mrb[12].mxu0 %v1168_v12  ;;  %658 = vmatmul.mubr.bf16.gmra.mrb[12].mxu1 %v1168_v12 }
  0xaa   : > { %v301_v13 = vpop.permute.xlu0 %300  ;;  %v311_v15 = vpop.permute.xlu1 %310 }
  0xae   : > { %v306_v14 = vpop.permute.xlu0 %305  ;;  %v1536_v45 = vpop.permute.xlu1 %315 }
 0x11f   : > { %v556_v16 = vpop.f32.mrb[0].mxu0  ;;  %v629_v17 = vpop.f32.mrb[0].mxu1 }
 0x120   : > { %v557_v18 = vadd.f32 %v556_v16, %v301_v13  ;;  %v630_v19 = vadd.f32 %v629_v17, %v301_v13  ;;  %v558_v20 = vpop.f32.mrb[1].mxu0  ;;  %v631_v21 = vpop.f32.mrb[1].mxu1 }
 0x121   : > { %v559_v22 = vadd.f32 %v558_v20, %v301_v13  ;;  %v632_v23 = vadd.f32 %v631_v21, %v301_v13  ;;  %v560_v24 = vpop.f32.mrb[2].mxu0  ;;  %v633_v25 = vpop.f32.mrb[2].mxu1 }
 0x122   : > { %v668_v26 = vsub.f32 0.0, %v557_v18  ;;  %v670_v27 = vsub.f32 0.0, %v630_v19  ;;  %v561_v28 = vadd.f32 %v560_v24, %v306_v14  ;;  %v634_v29 = vadd.f32 %v633_v25, %v306_v14  ;;  %v562_v30 = vpop.f32.mrb[3].mxu0  ;;  %v635_v31 = vpop.f32.mrb[3].mxu1 }
 0x123   : > { %v669_v32 = vsub.f32 0.0, %v559_v22  ;;  %v671_v33 = vsub.f32 0.0, %v632_v23  ;;  %v563_v34 = vadd.f32 %v562_v30, %v306_v14  ;;  %v636_v35 = vadd.f32 %v635_v31, %v306_v14 }
 0x124   : > { %v700_v36 = vmul.f32 1.442695, %v668_v26  ;;  %v704_v37 = vmul.f32 1.442695, %v670_v27  ;;  %v672_v38 = vsub.f32 0.0, %v561_v28  ;;  %v674_v39 = vsub.f32 0.0, %v634_v29 }
 0x125   : > { %v702_v40 = vmul.f32 1.442695, %v669_v32  ;;  %v706_v41 = vmul.f32 1.442695, %v671_v33  ;;  %v673_v42 = vsub.f32 0.0, %v563_v34  ;;  %v675_v43 = vsub.f32 0.0, %v636_v35  ;;  %v326_v33 = vpop.permute.xlu1 %325  ;;  %v321_v34 = vpop.permute.xlu0 %320 }
 0x126   : > { %1169 = vpow2.f32 %v700_v36  ;;  %v708_v44 = vmul.f32 1.442695, %v672_v38  ;;  %v712_v46 = vmul.f32 1.442695, %v674_v39 }
 0x127   : > { %1171 = vpow2.f32 %v704_v37  ;;  %v566_v47 = vpop.f32.mrb[4].mxu0  ;;  %v639_v48 = vpop.f32.mrb[4].mxu1  ;;  %v710_v49 = vmul.f32 1.442695, %v673_v42  ;;  %v714_v54 = vmul.f32 1.442695, %v675_v43 }
 0x128   : > { %1173 = vpow2.f32 %v702_v40  ;;  %v567_v50 = vadd.f32 %v566_v47, %v311_v15  ;;  %v640_v51 = vadd.f32 %v639_v48, %v311_v15  ;;  %v568_v52 = vpop.f32.mrb[5].mxu0  ;;  %v641_v53 = vpop.f32.mrb[5].mxu1 }
 0x129   : > { %1175 = vpow2.f32 %v706_v41  ;;  %v569_v55 = vadd.f32 %v568_v52, %v311_v15  ;;  %v642_v56 = vadd.f32 %v641_v53, %v311_v15  ;;  %v570_v57 = vpop.f32.mrb[6].mxu0  ;;  %v643_v58 = vpop.f32.mrb[6].mxu1 }
 0x12a   : > { %1177 = vpow2.f32 %v708_v44  ;;  %v676_v59 = vsub.f32 0.0, %v567_v50  ;;  %v678_v60 = vsub.f32 0.0, %v640_v51  ;;  %v571_v61 = vadd.f32 %v570_v57, %v1536_v45  ;;  %v572_v62 = vpop.f32.mrb[7].mxu0  ;;  %v645_v63 = vpop.f32.mrb[7].mxu1 }
 0x12b   : > { %1179 = vpow2.f32 %v712_v46  ;;  %v677_v0 = vsub.f32 0.0, %v569_v55  ;;  %v679_v1 = vsub.f32 0.0, %v642_v56  ;;  %v644_v11 = vadd.f32 %v643_v58, %v1536_v45 }
 0x12c   : > { %1181 = vpow2.f32 %v710_v49  ;;  %v716_v2 = vmul.f32 1.442695, %v676_v59  ;;  %v720_v3 = vmul.f32 1.442695, %v678_v60  ;;  %v680_v4 = vsub.f32 0.0, %v571_v61 }
 0x12d   : > { %1183 = vpow2.f32 %v714_v54  ;;  %v718_v5 = vmul.f32 1.442695, %v677_v0  ;;  %v722_v6 = vmul.f32 1.442695, %v679_v1  ;;  %v573_v20 = vadd.f32 %v572_v62, %v1536_v45 }
 0x12e   : > { %1185 = vpow2.f32 %v716_v2  ;;  %v724_v7 = vmul.f32 1.442695, %v680_v4  ;;  %v682_v27 = vsub.f32 0.0, %v644_v11  ;;  %v646_v30 = vadd.f32 %v645_v63, %v1536_v45 }
 0x12f   : > { %1187 = vpow2.f32 %v720_v3  ;;  %v576_v8 = vpop.f32.mrb[8].mxu0  ;;  %v649_v9 = vpop.f32.mrb[8].mxu1  ;;  %v681_v35 = vsub.f32 0.0, %v573_v20 }
 0x130   : > { %v1170_v10 = vpop.eup %1169  ;;  %1189 = vpow2.f32 %v718_v5  ;;  %v578_v12 = vpop.f32.mrb[9].mxu0  ;;  %v577_v38 = vadd.f32 %v576_v8, %v321_v34  ;;  %v728_v43 = vmul.f32 1.442695, %v682_v27  ;;  %v650_v44 = vadd.f32 %v649_v9, %v321_v34 }
 0x131   : > { %v651_v13 = vpop.f32.mrb[9].mxu1  ;;  %v1172_v14 = vpop.eup %1171  ;;  %v764_v15 = vadd.f32 1.0, %v1170_v10  ;;  %1191 = vpow2.f32 %v722_v6  ;;  %v683_v49 = vsub.f32 0.0, %v646_v30  ;;  %v579_v50 = vadd.f32 %v578_v12, %v321_v34 }
 0x132   : > { %v580_v16 = vpop.f32.mrb[10].mxu0  ;;  %v653_v17 = vpop.f32.mrb[10].mxu1  ;;  %v766_v19 = vadd.f32 1.0, %v1172_v14  ;;  %1193 = vpow2.f32 %v724_v7  ;;  %v726_v55 = vmul.f32 1.442695, %v681_v35  ;;  %v652_v56 = vadd.f32 %v651_v13, %v321_v34 }
 0x133   : > { %v1174_v18 = vpop.eup %1173  ;;  %v582_v21 = vpop.f32.mrb[11].mxu0  ;;  %1195 = vrcp.f32 %v764_v15  ;;  %v684_v61 = vsub.f32 0.0, %v577_v38  ;;  %v581_v62 = vadd.f32 %v580_v16, %v326_v33  ;;  %v686_v1 = vsub.f32 0.0, %v650_v44 }
 0x134   : > { %v1176_v22 = vpop.eup %1175  ;;  %v765_v23 = vadd.f32 1.0, %v1174_v18  ;;  %v1541_v24 = vpop.f32.mrb[11].mxu1  ;;  %1197 = vrcp.f32 %v766_v19  ;;  %v654_v2 = vadd.f32 %v653_v17, %v326_v33  ;;  %v685_v5 = vsub.f32 0.0, %v579_v50 }
 0x135   : > { %v1178_v25 = vpop.eup %1177  ;;  %v767_v26 = vadd.f32 1.0, %v1176_v22  ;;  %v583_v6 = vadd.f32 %v582_v21, %v326_v33  ;;  %v730_v8 = vmul.f32 1.442695, %v683_v49  ;;  %v1560_v9 = vpop.permute.xlu0 %330  ;;  %v687_v10 = vsub.f32 0.0, %v652_v56 }
 0x136   : > { %v1180_v28 = vpop.eup %1179  ;;  %1199 = vrcp.f32 %v765_v23  ;;  %v768_v29 = vadd.f32 1.0, %v1178_v25  ;;  %v656_v11 = vadd.f32 %v1541_v24, %v326_v33  ;;  %v732_v13 = vmul.f32 1.442695, %v684_v61  ;;  %v336_v56 = vpop.permute.xlu1 %335 }
 0x137   : > { %v1182_v31 = vpop.eup %1181  ;;  %1201 = vrcp.f32 %v767_v26  ;;  %v770_v32 = vadd.f32 1.0, %v1180_v28  ;;  %v586_v39 = vpop.f32.mrb[12].mxu0  ;;  %v688_v14 = vsub.f32 0.0, %v581_v62  ;;  %v736_v17 = vmul.f32 1.442695, %v686_v1 }
 0x138   : > { %v1184_v36 = vpop.eup %1183  ;;  %1203 = vrcp.f32 %v768_v29  ;;  %v769_v37 = vadd.f32 1.0, %v1182_v31  ;;  %v659_v40 = vpop.f32.mrb[12].mxu1  ;;  %v587_v15 = vadd.f32 %v586_v39, %v1560_v9  ;;  %v690_v18 = vsub.f32 0.0, %v654_v2 }
 0x139   : > { %v1186_v41 = vpop.eup %1185  ;;  %1205 = vrcp.f32 %v770_v32  ;;  %v771_v42 = vadd.f32 1.0, %v1184_v36  ;;  %v1544_v46 = vpop.f32.mrb[13].mxu0  ;;  %v660_v19 = vadd.f32 %v659_v40, %v1560_v9  ;;  %v734_v21 = vmul.f32 1.442695, %v685_v5 }
 0x13a   : > { %v1546_v45 = vpop.f32.mrb[13].mxu1  ;;  %v1188_v47 = vpop.eup %1187  ;;  %1207 = vrcp.f32 %v769_v37  ;;  %v772_v48 = vadd.f32 1.0, %v1186_v41  ;;  %v689_v22 = vsub.f32 0.0, %v583_v6  ;;  %v738_v24 = vmul.f32 1.442695, %v687_v10 }
 0x13b   : > { %v1548_v51 = vpop.f32.mrb[14].mxu0  ;;  %v1550_v52 = vpop.f32.mrb[14].mxu1  ;;  %1209 = vrcp.f32 %v771_v42  ;;  %v774_v54 = vadd.f32 1.0, %v1188_v47  ;;  %v691_v25 = vsub.f32 0.0, %v656_v11  ;;  %v740_v27 = vmul.f32 1.442695, %v688_v14 }
 0x13c   : > { %v1190_v53 = vpop.eup %1189  ;;  %v1552_v57 = vpop.f32.mrb[15].mxu0  ;;  %1211 = vrcp.f32 %v772_v48  ;;  %v692_v28 = vsub.f32 0.0, %v587_v15  ;;  %v744_v30 = vmul.f32 1.442695, %v690_v18  ;;  %v694_v31 = vsub.f32 0.0, %v660_v19 }
 0x13d   : > { %v1554_v58 = vpop.f32.mrb[15].mxu1  ;;  %v1192_v59 = vpop.eup %1191  ;;  %v773_v60 = vadd.f32 1.0, %v1190_v53  ;;  %1213 = vrcp.f32 %v774_v54  ;;  %v742_v33 = vmul.f32 1.442695, %v689_v22  ;;  %v746_v35 = vmul.f32 1.442695, %v691_v25 }
 0x13e   : > { %v1194_v63 = vpop.eup %1193  ;;  %v775_v0 = vadd.f32 1.0, %v1192_v59  ;;  %v748_v37 = vmul.f32 1.442695, %v692_v28  ;;  %v752_v39 = vmul.f32 1.442695, %v694_v31  ;;  %v589_v54 = vadd.f32 %v1544_v46, %v1560_v9 }
 0x13f   : > { %v1196_v3 = vpop.eup %1195  ;;  %1215 = vrcp.f32 %v773_v60  ;;  %v776_v4 = vadd.f32 1.0, %v1194_v63  ;;  %v662_v60 = vadd.f32 %v1546_v45, %v1560_v9  ;;  %v591_v63 = vadd.f32 %v1548_v51, %v336_v56 }
 0x140   : > { %v1198_v7 = vpop.eup %1197  ;;  %860 = vst [vmem:[%s1557_s8] sm:$0xff] %v1196_v3  ;;  %1217 = vrcp.f32 %v775_v0  ;;  %v664_v2 = vadd.f32 %v1550_v52, %v336_v56  ;;  %v593_v5 = vadd.f32 %v1552_v57, %v336_v56 }
 0x141   : > { %v1200_v12 = vpop.eup %1199  ;;  %862 = vst [vmem:[%s1557_s8 + $0x10] sm:$0xff] %v1198_v7  ;;  %1219 = vrcp.f32 %v776_v4  ;;  %v693_v4 = vsub.f32 0.0, %v589_v54  ;;  %v695_v45 = vsub.f32 0.0, %v662_v60  ;;  %v696_v10 = vsub.f32 0.0, %v591_v63 }
 0x142   : > { %v1202_v16 = vpop.eup %1201  ;;  %861 = vst [vmem:[%s1557_s8 + $0x8] sm:$0xff] %v1200_v12  ;;  %1221 = vpow2.f32 %v728_v43  ;;  %v698_v12 = vsub.f32 0.0, %v664_v2  ;;  %v697_v15 = vsub.f32 0.0, %v593_v5 }
 0x143   : > { %v1204_v20 = vpop.eup %1203  ;;  %863 = vst [vmem:[%s1557_s8 + $0x18] sm:$0xff] %v1202_v16  ;;  %1223 = vpow2.f32 %v726_v55  ;;  %v750_v57 = vmul.f32 1.442695, %v693_v4 }
 0x144   : > { %v1206_v23 = vpop.eup %1205  ;;  %864 = vst [vmem:[%s1557_s8 + $0x20] sm:$0xff] %v1204_v20  ;;  %1225 = vpow2.f32 %v730_v8  ;;  %v666_v8 = vadd.f32 %v1554_v58, %v336_v56  ;;  %v754_v58 = vmul.f32 1.442695, %v695_v45  ;;  %v756_v20 = vmul.f32 1.442695, %v696_v10 }
 0x145   : > { %v1208_v26 = vpop.eup %1207  ;;  %866 = vst [vmem:[%s1557_s8 + $0x30] sm:$0xff] %v1206_v23  ;;  %1227 = vpow2.f32 %v732_v13  ;;  %v760_v22 = vmul.f32 1.442695, %v698_v12 }
 0x146   : > { %v1210_v29 = vpop.eup %1209  ;;  %865 = vst [vmem:[%s1557_s8 + $0x28] sm:$0xff] %v1208_v26  ;;  %1229 = vpow2.f32 %v736_v17  ;;  %v699_v18 = vsub.f32 0.0, %v666_v8 }
 0x147   : > { %v1212_v32 = vpop.eup %1211  ;;  %867 = vst [vmem:[%s1557_s8 + $0x38] sm:$0xff] %v1210_v29  ;;  %1231 = vpow2.f32 %v734_v21 }
 0x148   : > { %v1214_v34 = vpop.eup %1213  ;;  %868 = vst [vmem:[%s1557_s8 + $0x40] sm:$0xff] %v1212_v32  ;;  %1233 = vpow2.f32 %v738_v24  ;;  %v758_v24 = vmul.f32 1.442695, %v697_v15  ;;  %v762_v26 = vmul.f32 1.442695, %v699_v18 }
 0x149   : > { %v1216_v36 = vpop.eup %1215  ;;  %870 = vst [vmem:[%s1557_s8 + $0x50] sm:$0xff] %v1214_v34  ;;  %1235 = vpow2.f32 %v740_v27  ;;  %v916_v60 = vld [vmem:[%s1557_s8 + $0x8] sm:$0xff] (%p1372_p5) }
 0x14a   : > { %v1218_v38 = vpop.eup %1217  ;;  %869 = vst [vmem:[%s1557_s8 + $0x48] sm:$0xff] %v1216_v36  ;;  %1237 = vpow2.f32 %v744_v30  ;;  %917 = vst [vmem:[%s1614_s20 + $0x8] sm:$0xff] (%p1372_p5), %v916_v60 }
 0x14b   : > { %v1220_v40 = vpop.eup %1219  ;;  %871 = vst [vmem:[%s1557_s8 + $0x58] sm:$0xff] %v1218_v38  ;;  %1239 = vpow2.f32 %v742_v33  ;;  %v922_v63 = vld [vmem:[%s1557_s8 + $0x20] sm:$0xff] (%p1372_p5) }
 0x14c   : > { %v1222_v41 = vpop.eup %1221  ;;  %872 = vst [vmem:[%s1557_s8 + $0x60] sm:$0xff] %v1220_v40  ;;  %1241 = vpow2.f32 %v746_v35  ;;  %923 = vst [vmem:[%s1614_s20 + $0x40] sm:$0xff] (%p1372_p5), %v922_v63 }
 0x14d   : > { %v1224_v42 = vpop.eup %1223  ;;  %v778_v43 = vadd.f32 1.0, %v1222_v41  ;;  %1243 = vpow2.f32 %v748_v37 }
 0x14e   : > { %v1226_v44 = vpop.eup %1225  ;;  %v777_v47 = vadd.f32 1.0, %v1224_v42  ;;  %1245 = vpow2.f32 %v752_v39  ;;  %v928_v2 = vld [vmem:[%s1557_s8 + $0x38] sm:$0xff] (%p1372_p5) }
 0x14f   : > { %v1228_v48 = vpop.eup %1227  ;;  %1247 = vrcp.f32 %v778_v43  ;;  %v779_v49 = vadd.f32 1.0, %v1226_v44  ;;  %929 = vst [vmem:[%s1614_s20 + $0x58] sm:$0xff] (%p1372_p5), %v928_v2 }
 0x150   : > { %v1230_v50 = vpop.eup %1229  ;;  %1249 = vrcp.f32 %v777_v47  ;;  %v780_v53 = vadd.f32 1.0, %v1228_v48  ;;  %v934_v4 = vld [vmem:[%s1557_s8 + $0x50] sm:$0xff] (%p1372_p5) }
 0x151   : > { %v1232_v55 = vpop.eup %1231  ;;  %1251 = vrcp.f32 %v779_v49  ;;  %v782_v59 = vadd.f32 1.0, %v1230_v50  ;;  %935 = vst [vmem:[%s1614_s20 + $0x90] sm:$0xff] (%p1372_p5), %v934_v4 }
 0x152   : > { %v1234_v61 = vpop.eup %1233  ;;  %1253 = vrcp.f32 %v780_v53  ;;  %v781_v62 = vadd.f32 1.0, %v1232_v55  ;;  %v936_v5 = vld [vmem:[%s1557_s8 + $0x58] sm:$0xff] (%p1372_p5) }
 0x153   : > { %v1236_v0 = vpop.eup %1235  ;;  %1255 = vrcp.f32 %v782_v59  ;;  %v783_v1 = vadd.f32 1.0, %v1234_v61  ;;  %v914_v59 = vld [vmem:[%s1557_s8] sm:$0xff] (%p1372_p5)  ;;  %v918_v61 = vld [vmem:[%s1557_s8 + $0x10] sm:$0xff] (%p1372_p5)  ;;  %937 = vst [vmem:[%s1614_s20 + $0x98] sm:$0xff] (%p1372_p5), %v936_v5 }
 0x154   : > { %v1238_v3 = vpop.eup %1237  ;;  %1257 = vrcp.f32 %v781_v62  ;;  %v784_v46 = vadd.f32 1.0, %v1236_v0  ;;  %v920_v62 = vld [vmem:[%s1557_s8 + $0x18] sm:$0xff] (%p1372_p5)  ;;  %v924_v0 = vld [vmem:[%s1557_s8 + $0x28] sm:$0xff] (%p1372_p5)  ;;  %915 = vst [vmem:[%s1614_s20] sm:$0xff] (%p1372_p5), %v914_v59  ;;  %919 = vst [vmem:[%s1614_s20 + $0x10] sm:$0xff] (%p1372_p5), %v918_v61 }
 0x155   : > { %v1240_v6 = vpop.eup %1239  ;;  %1259 = vrcp.f32 %v783_v1  ;;  %v786_v7 = vadd.f32 1.0, %v1238_v3  ;;  %921 = vst [vmem:[%s1614_s20 + $0x18] sm:$0xff] (%p1372_p5), %v920_v62  ;;  %925 = vst [vmem:[%s1614_s20 + $0x48] sm:$0xff] (%p1372_p5), %v924_v0  ;;  %v926_v1 = vld [vmem:[%s1557_s8 + $0x30] sm:$0xff] (%p1372_p5)  ;;  %v930_v3 = vld [vmem:[%s1557_s8 + $0x40] sm:$0xff] (%p1372_p5) }
 0x156   : > { %v1242_v9 = vpop.eup %1241  ;;  %1261 = vrcp.f32 %v784_v46  ;;  %v785_v51 = vadd.f32 1.0, %v1240_v6  ;;  %927 = vst [vmem:[%s1614_s20 + $0x50] sm:$0xff] (%p1372_p5), %v926_v1  ;;  %931 = vst [vmem:[%s1614_s20 + $0x80] sm:$0xff] (%p1372_p5), %v930_v3  ;;  %v932_v46 = vld [vmem:[%s1557_s8 + $0x48] sm:$0xff] (%p1372_p5)  ;;  %v938_v6 = vld [vmem:[%s1557_s8 + $0x60] sm:$0xff] (%p1372_p5) }
 0x157   : > { %v1244_v11 = vpop.eup %1243  ;;  %1263 = vrcp.f32 %v786_v7  ;;  %v787_v52 = vadd.f32 1.0, %v1242_v9  ;;  %933 = vst [vmem:[%s1614_s20 + $0x88] sm:$0xff] (%p1372_p5), %v932_v46  ;;  %939 = vst [vmem:[%s1614_s20 + $0xc0] sm:$0xff] (%p1372_p5), %v938_v6 }
 0x158   : > { %v1246_v13 = vpop.eup %1245  ;;  %1265 = vrcp.f32 %v785_v51  ;;  %v788_v14 = vadd.f32 1.0, %v1244_v11 }
 0x159   : > { %v1248_v16 = vpop.eup %1247  ;;  %1267 = vrcp.f32 %v787_v52  ;;  %v790_v17 = vadd.f32 1.0, %v1246_v13 }
 0x15a   : > { %v1250_v19 = vpop.eup %1249  ;;  %874 = vst [vmem:[%s1557_s8 + $0x70] sm:$0xff] %v1248_v16  ;;  %1269 = vrcp.f32 %v788_v14 }
 0x15b   : > { %v1252_v21 = vpop.eup %1251  ;;  %873 = vst [vmem:[%s1557_s8 + $0x68] sm:$0xff] %v1250_v19  ;;  %1271 = vrcp.f32 %v790_v17 }
 0x15c   : > { %v1254_v23 = vpop.eup %1253  ;;  %875 = vst [vmem:[%s1557_s8 + $0x78] sm:$0xff] %v1252_v21  ;;  %1273 = vpow2.f32 %v750_v57 }
 0x15d   : > { %v1256_v25 = vpop.eup %1255  ;;  %876 = vst [vmem:[%s1557_s8 + $0x80] sm:$0xff] %v1254_v23  ;;  %1275 = vpow2.f32 %v754_v58 }
 0x15e   : > { %v1258_v27 = vpop.eup %1257  ;;  %878 = vst [vmem:[%s1557_s8 + $0x90] sm:$0xff] %v1256_v25  ;;  %1277 = vpow2.f32 %v756_v20 }
 0x15f   : > { %v1260_v28 = vpop.eup %1259  ;;  %877 = vst [vmem:[%s1557_s8 + $0x88] sm:$0xff] %v1258_v27  ;;  %1279 = vpow2.f32 %v760_v22 }
 0x160   : > { %v1262_v29 = vpop.eup %1261  ;;  %879 = vst [vmem:[%s1557_s8 + $0x98] sm:$0xff] %v1260_v28  ;;  %1281 = vpow2.f32 %v758_v24 }
 0x161   : > { %v1264_v30 = vpop.eup %1263  ;;  %880 = vst [vmem:[%s1557_s8 + $0xa0] sm:$0xff] %v1262_v29  ;;  %1283 = vpow2.f32 %v762_v26  ;;  %v942_v45 = vld [vmem:[%s1557_s8 + $0x70] sm:$0xff] (%p1372_p5) }
 0x162   : > { %v1266_v31 = vpop.eup %1265  ;;  %882 = vst [vmem:[%s1557_s8 + $0xb0] sm:$0xff] %v1264_v30  ;;  %v940_v7 = vld [vmem:[%s1557_s8 + $0x68] sm:$0xff] (%p1372_p5)  ;;  %943 = vst [vmem:[%s1614_s20 + $0xd0] sm:$0xff] (%p1372_p5), %v942_v45 }
 0x163   : > { %v1268_v32 = vpop.eup %1267  ;;  %881 = vst [vmem:[%s1557_s8 + $0xa8] sm:$0xff] %v1266_v31  ;;  %941 = vst [vmem:[%s1614_s20 + $0xc8] sm:$0xff] (%p1372_p5), %v940_v7  ;;  %v944_v8 = vld [vmem:[%s1557_s8 + $0x78] sm:$0xff] (%p1372_p5) }
 0x164   : > { %v1270_v33 = vpop.eup %1269  ;;  %883 = vst [vmem:[%s1557_s8 + $0xb8] sm:$0xff] %v1268_v32  ;;  %v946_v9 = vld [vmem:[%s1557_s8 + $0x80] sm:$0xff] (%p1372_p5)  ;;  %945 = vst [vmem:[%s1614_s20 + $0xd8] sm:$0xff] (%p1372_p5), %v944_v8 }
 0x165   : > { %v1272_v34 = vpop.eup %1271  ;;  %884 = vst [vmem:[%s1557_s8 + $0xc0] sm:$0xff] %v1270_v33  ;;  %947 = vst [vmem:[%s1614_s20 + $0x100] sm:$0xff] (%p1372_p5), %v946_v9  ;;  %v950_v10 = vld [vmem:[%s1557_s8 + $0x90] sm:$0xff] (%p1372_p5) }
 0x166   : > { %v1274_v35 = vpop.eup %1273  ;;  %886 = vst [vmem:[%s1557_s8 + $0xd0] sm:$0xff] %v1272_v34  ;;  %v948_v51 = vld [vmem:[%s1557_s8 + $0x88] sm:$0xff] (%p1372_p5)  ;;  %951 = vst [vmem:[%s1614_s20 + $0x110] sm:$0xff] (%p1372_p5), %v950_v10 }
 0x167   : > { %v1276_v36 = vpop.eup %1275  ;;  %v789_v37 = vadd.f32 1.0, %v1274_v35  ;;  %949 = vst [vmem:[%s1614_s20 + $0x108] sm:$0xff] (%p1372_p5), %v948_v51  ;;  %v952_v11 = vld [vmem:[%s1557_s8 + $0x98] sm:$0xff] (%p1372_p5) }
 0x168   : > { %v1278_v38 = vpop.eup %1277  ;;  %v791_v39 = vadd.f32 1.0, %v1276_v36  ;;  %v954_v52 = vld [vmem:[%s1557_s8 + $0xa0] sm:$0xff] (%p1372_p5)  ;;  %953 = vst [vmem:[%s1614_s20 + $0x118] sm:$0xff] (%p1372_p5), %v952_v11 }
 0x169   : > { %v1280_v40 = vpop.eup %1279  ;;  %1285 = vrcp.f32 %v789_v37  ;;  %v792_v41 = vadd.f32 1.0, %v1278_v38  ;;  %955 = vst [vmem:[%s1614_s20 + $0x140] sm:$0xff] (%p1372_p5), %v954_v52  ;;  %v958_v13 = vld [vmem:[%s1557_s8 + $0xb0] sm:$0xff] (%p1372_p5) }
 0x16a   : > { %v1282_v42 = vpop.eup %1281  ;;  %1287 = vrcp.f32 %v791_v39  ;;  %v794_v43 = vadd.f32 1.0, %v1280_v40  ;;  %v956_v12 = vld [vmem:[%s1557_s8 + $0xa8] sm:$0xff] (%p1372_p5)  ;;  %959 = vst [vmem:[%s1614_s20 + $0x150] sm:$0xff] (%p1372_p5), %v958_v13 }
 0x16b   : > { %v1284_v44 = vpop.eup %1283  ;;  %1289 = vrcp.f32 %v792_v41  ;;  %v793_v47 = vadd.f32 1.0, %v1282_v42  ;;  %v960_v14 = vld [vmem:[%s1557_s8 + $0xb8] sm:$0xff] (%p1372_p5)  ;;  %957 = vst [vmem:[%s1614_s20 + $0x148] sm:$0xff] (%p1372_p5), %v956_v12 }
 0x16c   : > { %1291 = vrcp.f32 %v794_v43  ;;  %v795_v48 = vadd.f32 1.0, %v1284_v44  ;;  %961 = vst [vmem:[%s1614_s20 + $0x158] sm:$0xff] (%p1372_p5), %v960_v14  ;;  %v962_v57 = vld [vmem:[%s1557_s8 + $0xc0] sm:$0xff] (%p1372_p5) }
 0x16d   : > { %1293 = vrcp.f32 %v793_v47  ;;  %v966_v16 = vld [vmem:[%s1557_s8 + $0xd0] sm:$0xff] (%p1372_p5)  ;;  %963 = vst [vmem:[%s1614_s20 + $0x180] sm:$0xff] (%p1372_p5), %v962_v57 }
 0x16e   : > { %1295 = vrcp.f32 %v795_v48  ;;  %967 = vst [vmem:[%s1614_s20 + $0x190] sm:$0xff] (%p1372_p5), %v966_v16 }
 0x173   : > { %v1286_v49 = vpop.eup %1285  ;;  %898 = sbr.rel (!%p1372_p5) target bundleno = 386 (0x182), region = 59 }
 0x174   : > { %v1288_v50 = vpop.eup %1287  ;;  %885 = vst [vmem:[%s1557_s8 + $0xc8] sm:$0xff] %v1286_v49 }
 0x175   : > { %v1290_v53 = vpop.eup %1289  ;;  %887 = vst [vmem:[%s1557_s8 + $0xd8] sm:$0xff] %v1288_v50 }
 0x176   : > { %v1292_v54 = vpop.eup %1291  ;;  %888 = vst [vmem:[%s1557_s8 + $0xe0] sm:$0xff] %v1290_v53 }
 0x177   : > { %v1294_v55 = vpop.eup %1293  ;;  %890 = vst [vmem:[%s1557_s8 + $0xf0] sm:$0xff] %v1292_v54 }
 0x178   : > { %v1296_v56 = vpop.eup %1295  ;;  %889 = vst [vmem:[%s1557_s8 + $0xe8] sm:$0xff] %v1294_v55 }
 0x179   : > { %891 = vst [vmem:[%s1557_s8 + $0xf8] sm:$0xff] %v1296_v56 }
 0x17b   : > { %v964_v15 = vld [vmem:[%s1557_s8 + $0xc8] sm:$0xff] }
 0x17c   : > { %965 = vst [vmem:[%s1614_s20 + $0x188] sm:$0xff] %v964_v15  ;;  %v968_v17 = vld [vmem:[%s1557_s8 + $0xd8] sm:$0xff] }
 0x17d   : > { %v970_v58 = vld [vmem:[%s1557_s8 + $0xe0] sm:$0xff]  ;;  %969 = vst [vmem:[%s1614_s20 + $0x198] sm:$0xff] %v968_v17 }
 0x17e   : > { %971 = vst [vmem:[%s1614_s20 + $0x1c0] sm:$0xff] %v970_v58  ;;  %v974_v19 = vld [vmem:[%s1557_s8 + $0xf0] sm:$0xff] }
 0x17f   : > { %v972_v18 = vld [vmem:[%s1557_s8 + $0xe8] sm:$0xff]  ;;  %975 = vst [vmem:[%s1614_s20 + $0x1d0] sm:$0xff] %v974_v19 }
 0x180   : > { %973 = vst [vmem:[%s1614_s20 + $0x1c8] sm:$0xff] %v972_v18  ;;  %v976_v20 = vld [vmem:[%s1557_s8 + $0xf8] sm:$0xff] }
 0x181   : > { %977 = vst [vmem:[%s1614_s20 + $0x1d8] sm:$0xff] %v976_v20 }
 0x182 PF: > { %p10_p10 = scmp.ge.s32.totalorder %s1359_s16, 4   ;;  %s1692_s12 = smov %s1315_s13 }
 0x183   : > { %s1693_s13 = smov %s1370_s19  ;;  %s1694_s14 = smov %s1359_s16 }
 0x184   :  { %12 = sbr.rel (!%p10_p10) target bundleno = 2 (0x2), region = 113 }

</bundles_post_ra>
